<compile_context>
chip_gen: v7x
topology: tpu7x:2x2x1
jax: 0.10.0
libtpu: 0.0.40
codegen_flags: <defaults>
</compile_context>

<pallas_src>
import functools
from typing import NamedTuple

import numpy as np
import jax
import jax.numpy as jnp
from jax import lax
from jax.experimental import pallas as pl
from jax.experimental.pallas import tpu as pltpu


D_PAD = 128  # lane-dense working width (one full vreg lane dimension)


class DecoderConfig(NamedTuple):
    z_dim: int
    x_dim: int
    lift_layers: int
    n_gin_blocks: int
    layers_per_block: int
    layers_per_gin: int
    d_pad: int
    obs_model: str


def _round_up(n, m):
    return ((n + m - 1) // m) * m


def _softplus(x):
    # Numerically stable softplus; identical formula in kernel and reference.
    return jnp.maximum(x, 0.0) + jnp.log(1.0 + jnp.exp(-jnp.abs(x)))


# ---------------------------------------------------------------------------
# Synthetic parameters (PyTorch nn.Linear-style init) + host-side packing.
# ---------------------------------------------------------------------------

def make_decoder_params(key, z_dim, x_dim, n_gin_blocks, layers_per_gin,
                        layers_per_block, hidden_size, lift_mlp_layers=3,
                        obs_model="poisson", dtype=jnp.float32):
    assert x_dim >= z_dim and x_dim % 2 == 0
    assert layers_per_gin >= 3 and lift_mlp_layers >= 3
    assert n_gin_blocks >= 1
    hidden_size = max(hidden_size, x_dim // 4)
    split = x_dim // 2
    assert max(x_dim, hidden_size) <= D_PAD

    def mlp_dims(in_c, out_c, n_layers):
        return [in_c] + [hidden_size] * (n_layers - 1) + [out_c]

    shapes = [mlp_dims(z_dim, x_dim - z_dim, lift_mlp_layers)]
    for _ in range(n_gin_blocks * layers_per_block):
        shapes.append(mlp_dims(split, 2 * split - 1, layers_per_gin))

    mlps = []
    for dims in shapes:
        layers = []
        for li in range(len(dims) - 1):
            fan_in, fan_out = dims[li], dims[li + 1]
            key, kw, kb = jax.random.split(key, 3)
            bound = float(fan_in) ** -0.5
            w = jax.random.uniform(kw, (fan_in, fan_out), dtype,
                                   minval=-bound, maxval=bound)
            b = jax.random.uniform(kb, (fan_out,), dtype,
                                   minval=-bound, maxval=bound)
            layers.append((w, b))
        mlps.append(layers)

    perms = []
    for _ in range(n_gin_blocks):
        key, kp = jax.random.split(key)
        perms.append(np.asarray(jax.random.permutation(kp, x_dim)))

    cfg = DecoderConfig(z_dim=z_dim, x_dim=x_dim, lift_layers=lift_mlp_layers,
                        n_gin_blocks=n_gin_blocks,
                        layers_per_block=layers_per_block,
                        layers_per_gin=layers_per_gin,
                        d_pad=D_PAD, obs_model=obs_model)
    return mlps, perms, cfg


def pack_decoder_params(mlps, perms, cfg):
    """Zero-pad every layer to (128,128)/(1,128) and fold lane placement of
    MLP outputs into the packed columns (lift -> lanes [z_dim, x_dim);
    GIN st -> t in [0, split), s in [split, x_dim-1))."""
    D = cfg.d_pad
    split = cfg.x_dim // 2
    w_slabs, b_slabs = [], []

    def pack_mlp(layers, out_cols):
        n = len(layers)
        for li, (w, b) in enumerate(layers):
            w = np.asarray(w, np.float32)
            b = np.asarray(b, np.float32)
            fan_in, fan_out = w.shape
            cols = out_cols if li == n - 1 else np.arange(fan_out)
            wp = np.zeros((D, D), np.float32)
            bp = np.zeros((1, D), np.float32)
            wp[:fan_in, cols] = w
            bp[0, cols] = b
            w_slabs.append(wp)
            b_slabs.append(bp)

    # Lift MLP output goes to lanes [z_dim, x_dim) -> concat([z, y]) is an add.
    pack_mlp(mlps[0], cfg.z_dim + np.arange(cfg.x_dim - cfg.z_dim))

    # GIN MLP output reorder: t -> lanes [0, split) (aligned with new lower
    # half), s -> lanes [split, x_dim-1) (aligned with x1).
    gin_cols = np.empty(2 * split - 1, dtype=np.int64)
    gin_cols[:split - 1] = split + np.arange(split - 1)
    gin_cols[split - 1:] = np.arange(split)
    for layers in mlps[1:]:
        pack_mlp(layers, gin_cols)

    w_all = jnp.asarray(np.stack(w_slabs))     # (L, D, D)
    b_all = jnp.asarray(np.stack(b_slabs))     # (L, 1, D)

    p_mats = []
    for p in perms:
        pm = np.zeros((D, D), np.float32)
        pm[np.asarray(p), np.arange(cfg.x_dim)] = 1.0   # out[:, j] = x[:, p[j]]
        p_mats.append(pm)
    p_all = jnp.asarray(np.stack(p_mats))      # (n_gin_blocks, D, D)

    swap = np.zeros((D, D), np.float32)        # swap halves [0,split)<->[split,x_dim)
    k = np.arange(split)
    swap[k + split, k] = 1.0
    swap[k, k + split] = 1.0
    swap = jnp.asarray(swap)

    return w_all, b_all, p_all, swap


# ---------------------------------------------------------------------------
# Pallas kernel.
# ---------------------------------------------------------------------------

def _decoder_kernel(z_ref, w_ref, b_ref, p_ref, swap_ref, out_ref, *, cfg):
    D = cfg.d_pad
    x_dim = cfg.x_dim
    split = x_dim // 2
    bb = z_ref.shape[0]

    lane = lax.broadcasted_iota(jnp.int32, (bb, D), 1)
    mask_x0 = lane < split
    mask_s = jnp.logical_and(lane >= split, lane < x_dim - 1)
    last_lane = lane == (x_dim - 1)

    def mlp(h, start, n_layers):
        # All layers padded to 128x128; padded lanes carry exact zeros.
        for j in range(n_layers):
            li = start + j
            h = (jnp.dot(h, w_ref[li], preferred_element_type=jnp.float32)
                 + b_ref[li])
            if j < n_layers - 1:
                h = jnp.maximum(h, 0.0)          # ReLU
        return h

    def lane_move(x, mat):
        # Lane permutation / half-swap as a matmul with a 0/1 matrix.
        # hi/lo bf16 split keeps the result f32-accurate regardless of how the
        # MXU rounds f32 operands.
        x_hi = x.astype(jnp.bfloat16).astype(jnp.float32)
        x_lo = x - x_hi
        return (jnp.dot(x_hi, mat, preferred_element_type=jnp.float32)
                + jnp.dot(x_lo, mat, preferred_element_type=jnp.float32))

    zd = z_ref[...].astype(jnp.float32)          # z in lanes [0, z_dim), rest 0
    # x = concat([z, mlp(z)]): lift output is pre-packed into lanes [z_dim, x_dim).
    xd = zd + mlp(zd, 0, cfg.lift_layers)

    swap = swap_ref[...]
    layer = cfg.lift_layers
    for g in range(cfg.n_gin_blocks):
        xd = lane_move(xd, p_ref[g])             # channel permutation
        for _ in range(cfg.layers_per_block):
            x0 = jnp.where(mask_x0, xd, 0.0)
            st = mlp(x0, layer, cfg.layers_per_gin)
            layer += cfg.layers_per_gin
            # s lives in lanes [split, x_dim-1); t lives in lanes [0, split).
            s = jnp.where(mask_s, 0.1 * jnp.tanh(st), 0.0)
            s = jnp.where(last_lane, -jnp.sum(s, axis=-1, keepdims=True), s)
            q = xd * jnp.exp(s)                  # x0 | x1 * exp(s_full) | 0
            q = lane_move(q, swap)               # x1*exp(s_full) | x0 | 0
            xd = q + jnp.where(mask_x0, st, 0.0)  # transformed | x0 | 0

    if cfg.obs_model == "poisson":
        xd = _softplus(xd)
    out_ref[...] = xd.astype(out_ref.dtype)


@functools.partial(jax.jit, static_argnames=("cfg", "block_b"))
def decoder_forward(z, w_all, b_all, p_all, swap, cfg, block_b=None):
    """Pallas-accelerated Decoder.forward; returns (B, x_dim)."""
    B = z.shape[0]
    D = cfg.d_pad
    if block_b is None:
        # Large batch tiles amortize the ~0.35us per-grid-step overhead;
        # weights stay resident, activations are only block_b*128*4 bytes.
        block_b = min(512, _round_up(B, 8))
    assert block_b % 8 == 0
    Bp = _round_up(B, block_b)

    # Host-side lane padding of z -> lane-dense (block_b, 128) input tiles.
    z_pad = jnp.zeros((Bp, D), jnp.float32).at[:B, :cfg.z_dim].set(
        z.astype(jnp.float32))

    L = w_all.shape[0]
    n_gin = p_all.shape[0]
    grid = (Bp // block_b,)

    kernel = functools.partial(_decoder_kernel, cfg=cfg)
    out = pl.pallas_call(
        kernel,
        grid=grid,
        in_specs=[
            pl.BlockSpec((block_b, D), lambda i: (i, 0)),
            pl.BlockSpec((L, D, D), lambda i: (0, 0, 0)),
            pl.BlockSpec((L, 1, D), lambda i: (0, 0, 0)),
            pl.BlockSpec((n_gin, D, D), lambda i: (0, 0, 0)),
            pl.BlockSpec((D, D), lambda i: (0, 0)),
        ],
        out_specs=pl.BlockSpec((block_b, D), lambda i: (i, 0)),
        out_shape=jax.ShapeDtypeStruct((Bp, D), jnp.float32),
        compiler_params=pltpu.CompilerParams(
            dimension_semantics=("parallel",)),
    )(z_pad, w_all, b_all, p_all, swap)
    return out[:B, :cfg.x_dim]


# ---------------------------------------------------------------------------
# Pure-JAX reference (mirrors the PyTorch Decoder.forward exactly).
# ---------------------------------------------------------------------------

def decoder_forward_ref(z, mlps, perms, cfg):
    def run_mlp(h, layers):
        for li, (w, b) in enumerate(layers):
            h = jnp.dot(h, w) + b
            if li < len(layers) - 1:
                h = jnp.maximum(h, 0.0)
        return h

    split = cfg.x_dim // 2
    y = run_mlp(z, mlps[0])
    x = jnp.concatenate([z, y], axis=-1)
    mi = 1
    for g in range(cfg.n_gin_blocks):
        x = x[:, perms[g]]
        for _ in range(cfg.layers_per_block):
            x0, x1 = x[:, :split], x[:, split:]
            st = run_mlp(x0, mlps[mi]); mi += 1
            n = st.shape[-1]
            s, t = st[:, :n // 2], st[:, n // 2:]
            s = 0.1 * jnp.tanh(s)
            s = jnp.concatenate([s, -jnp.sum(s, axis=-1, keepdims=True)], -1)
            x = jnp.concatenate([x1 * jnp.exp(s) + t, x0], axis=-1)
    return _softplus(x) if cfg.obs_model == "poisson" else x


if __name__ == "__main__":
    z_dim, x_dim, hidden = 4, 16, 32
    n_gin_blocks, layers_per_gin, layers_per_block = 2, 3, 2
    B = 16

    key = jax.random.PRNGKey(0)
    kz, kp = jax.random.split(key)
    z = jax.random.normal(kz, (B, z_dim), dtype=jnp.float32)

    mlps, perms, cfg = make_decoder_params(
        kp, z_dim, x_dim, n_gin_blocks, layers_per_gin, layers_per_block,
        hidden_size=hidden, lift_mlp_layers=3, obs_model="poisson")
    w_all, b_all, p_all, swap = pack_decoder_params(mlps, perms, cfg)

    # block_b=8 -> grid=(2,): small test but still >=2 parallel grid steps
    # (keeps both v7x TensorCores busy).  Real workloads: block_b=512-2048.
    x = decoder_forward(z, w_all, b_all, p_all, swap, cfg=cfg, block_b=8)
    jax.block_until_ready(x)

    x_ref = decoder_forward_ref(z, mlps, perms, cfg)
    assert x.shape == (B, x_dim)
    err = float(jnp.max(jnp.abs(x - x_ref)))
    assert jnp.allclose(x, x_ref, atol=1e-3, rtol=1e-3), f"max abs err {err}"

    print("KERNEL_OK")
</pallas_src>

<mosaic_0001>
module attributes {stable_mosaic.version = 11 : i64} {
  func.func @_decoder_kernel(%arg0: i32, %arg1: memref<8x128xf32, #tpu.memory_space<vmem>>, %arg2: memref<15x128x128xf32, #tpu.memory_space<vmem>>, %arg3: memref<15x1x128xf32, #tpu.memory_space<vmem>>, %arg4: memref<2x128x128xf32, #tpu.memory_space<vmem>>, %arg5: memref<128x128xf32, #tpu.memory_space<vmem>>, %arg6: memref<8x128xf32, #tpu.memory_space<vmem>>) attributes {dimension_semantics = [#tpu.dimension_semantics<parallel>], iteration_bounds = array<i64: 2>, scalar_prefetch = 0 : i64, scratch_operands = 0 : i64, tpu.core_type = #tpu.core_type<tc>, window_params = [{transform_indices = @transform_0, window_bounds = array<i64: 8, 128>}, {pipeline_mode = #tpu.pipeline_mode<synchronous>, transform_indices = @transform_1, window_bounds = array<i64: 15, 128, 128>}, {pipeline_mode = #tpu.pipeline_mode<synchronous>, transform_indices = @transform_2, window_bounds = array<i64: 15, 1, 128>}, {pipeline_mode = #tpu.pipeline_mode<synchronous>, transform_indices = @transform_3, window_bounds = array<i64: 2, 128, 128>}, {pipeline_mode = #tpu.pipeline_mode<synchronous>, transform_indices = @transform_4, window_bounds = array<i64: 128, 128>}, {transform_indices = @transform_5, window_bounds = array<i64: 8, 128>}]} {
    %0 = tpu.iota {dimensions = array<i32: 1>} : vector<8x128xi32>
    %c8_i32 = arith.constant 8 : i32
    %1 = vector.broadcast %c8_i32 : i32 to vector<8x128xi32>
    %2 = arith.cmpi slt, %0, %1 : vector<8x128xi32>
    %c8_i32_0 = arith.constant 8 : i32
    %3 = vector.broadcast %c8_i32_0 : i32 to vector<8x128xi32>
    %4 = arith.cmpi sge, %0, %3 : vector<8x128xi32>
    %c15_i32 = arith.constant 15 : i32
    %5 = vector.broadcast %c15_i32 : i32 to vector<8x128xi32>
    %6 = arith.cmpi slt, %0, %5 : vector<8x128xi32>
    %7 = arith.andi %4, %6 : vector<8x128xi1>
    %c15_i32_1 = arith.constant 15 : i32
    %8 = vector.broadcast %c15_i32_1 : i32 to vector<8x128xi32>
    %9 = arith.cmpi eq, %0, %8 : vector<8x128xi32>
    %c0 = arith.constant 0 : index
    %c0_2 = arith.constant 0 : index
    %10 = vector.load %arg1[%c0, %c0_2] : memref<8x128xf32, #tpu.memory_space<vmem>>, vector<8x128xf32>
    %c0_3 = arith.constant 0 : index
    %c0_4 = arith.constant 0 : index
    %c0_5 = arith.constant 0 : index
    %11 = vector.load %arg2[%c0_3, %c0_4, %c0_5] : memref<15x128x128xf32, #tpu.memory_space<vmem>>, vector<1x128x128xf32>
    %12 = vector.shape_cast %11 : vector<1x128x128xf32> to vector<128x128xf32>
    %cst = arith.constant dense<0.000000e+00> : vector<8x128xf32>
    %13 = tpu.matmul %10, %12, %cst {dimension_numbers = #tpu.dot_dimension_numbers<[1], [0], [0], [1], [0, 0, 1, 1], [], []>} : vector<8x128xf32>, vector<128x128xf32>, vector<8x128xf32> -> vector<8x128xf32>
    %c0_6 = arith.constant 0 : index
    %c0_7 = arith.constant 0 : index
    %c0_8 = arith.constant 0 : index
    %14 = vector.load %arg3[%c0_6, %c0_7, %c0_8] : memref<15x1x128xf32, #tpu.memory_space<vmem>>, vector<1x1x128xf32>
    %15 = vector.shape_cast %14 : vector<1x1x128xf32> to vector<1x128xf32>
    %16 = vector.broadcast %15 : vector<1x128xf32> to vector<8x128xf32>
    %17 = arith.addf %13, %16 : vector<8x128xf32>
    %cst_9 = arith.constant 0.000000e+00 : f32
    %18 = vector.broadcast %cst_9 : f32 to vector<8x128xf32>
    %19 = arith.maximumf %17, %18 : vector<8x128xf32>
    %c1 = arith.constant 1 : index
    %c0_10 = arith.constant 0 : index
    %c0_11 = arith.constant 0 : index
    %20 = vector.load %arg2[%c1, %c0_10, %c0_11] : memref<15x128x128xf32, #tpu.memory_space<vmem>>, vector<1x128x128xf32>
    %21 = vector.shape_cast %20 : vector<1x128x128xf32> to vector<128x128xf32>
    %cst_12 = arith.constant dense<0.000000e+00> : vector<8x128xf32>
    %22 = tpu.matmul %19, %21, %cst_12 {dimension_numbers = #tpu.dot_dimension_numbers<[1], [0], [0], [1], [0, 0, 1, 1], [], []>} : vector<8x128xf32>, vector<128x128xf32>, vector<8x128xf32> -> vector<8x128xf32>
    %c1_13 = arith.constant 1 : index
    %c0_14 = arith.constant 0 : index
    %c0_15 = arith.constant 0 : index
    %23 = vector.load %arg3[%c1_13, %c0_14, %c0_15] : memref<15x1x128xf32, #tpu.memory_space<vmem>>, vector<1x1x128xf32>
    %24 = vector.shape_cast %23 : vector<1x1x128xf32> to vector<1x128xf32>
    %25 = vector.broadcast %24 : vector<1x128xf32> to vector<8x128xf32>
    %26 = arith.addf %22, %25 : vector<8x128xf32>
    %cst_16 = arith.constant 0.000000e+00 : f32
    %27 = vector.broadcast %cst_16 : f32 to vector<8x128xf32>
    %28 = arith.maximumf %26, %27 : vector<8x128xf32>
    %c2 = arith.constant 2 : index
    %c0_17 = arith.constant 0 : index
    %c0_18 = arith.constant 0 : index
    %29 = vector.load %arg2[%c2, %c0_17, %c0_18] : memref<15x128x128xf32, #tpu.memory_space<vmem>>, vector<1x128x128xf32>
    %30 = vector.shape_cast %29 : vector<1x128x128xf32> to vector<128x128xf32>
    %cst_19 = arith.constant dense<0.000000e+00> : vector<8x128xf32>
    %31 = tpu.matmul %28, %30, %cst_19 {dimension_numbers = #tpu.dot_dimension_numbers<[1], [0], [0], [1], [0, 0, 1, 1], [], []>} : vector<8x128xf32>, vector<128x128xf32>, vector<8x128xf32> -> vector<8x128xf32>
    %c2_20 = arith.constant 2 : index
    %c0_21 = arith.constant 0 : index
    %c0_22 = arith.constant 0 : index
    %32 = vector.load %arg3[%c2_20, %c0_21, %c0_22] : memref<15x1x128xf32, #tpu.memory_space<vmem>>, vector<1x1x128xf32>
    %33 = vector.shape_cast %32 : vector<1x1x128xf32> to vector<1x128xf32>
    %34 = vector.broadcast %33 : vector<1x128xf32> to vector<8x128xf32>
    %35 = arith.addf %31, %34 : vector<8x128xf32>
    %36 = arith.addf %10, %35 : vector<8x128xf32>
    %c0_23 = arith.constant 0 : index
    %c0_24 = arith.constant 0 : index
    %37 = vector.load %arg5[%c0_23, %c0_24] : memref<128x128xf32, #tpu.memory_space<vmem>>, vector<128x128xf32>
    %c0_25 = arith.constant 0 : index
    %c0_26 = arith.constant 0 : index
    %c0_27 = arith.constant 0 : index
    %38 = vector.load %arg4[%c0_25, %c0_26, %c0_27] : memref<2x128x128xf32, #tpu.memory_space<vmem>>, vector<1x128x128xf32>
    %39 = vector.shape_cast %38 : vector<1x128x128xf32> to vector<128x128xf32>
    %40 = arith.truncf %36 : vector<8x128xf32> to vector<8x128xbf16>
    %41 = arith.extf %40 : vector<8x128xbf16> to vector<8x128xf32>
    %42 = arith.subf %36, %41 : vector<8x128xf32>
    %cst_28 = arith.constant dense<0.000000e+00> : vector<8x128xf32>
    %43 = tpu.matmul %41, %39, %cst_28 {dimension_numbers = #tpu.dot_dimension_numbers<[1], [0], [0], [1], [0, 0, 1, 1], [], []>} : vector<8x128xf32>, vector<128x128xf32>, vector<8x128xf32> -> vector<8x128xf32>
    %cst_29 = arith.constant dense<0.000000e+00> : vector<8x128xf32>
    %44 = tpu.matmul %42, %39, %cst_29 {dimension_numbers = #tpu.dot_dimension_numbers<[1], [0], [0], [1], [0, 0, 1, 1], [], []>} : vector<8x128xf32>, vector<128x128xf32>, vector<8x128xf32> -> vector<8x128xf32>
    %45 = arith.addf %43, %44 : vector<8x128xf32>
    %cst_30 = arith.constant 0.000000e+00 : f32
    %46 = vector.broadcast %cst_30 : f32 to vector<8x128xf32>
    %47 = arith.select %2, %45, %46 : vector<8x128xi1>, vector<8x128xf32>
    %c3 = arith.constant 3 : index
    %c0_31 = arith.constant 0 : index
    %c0_32 = arith.constant 0 : index
    %48 = vector.load %arg2[%c3, %c0_31, %c0_32] : memref<15x128x128xf32, #tpu.memory_space<vmem>>, vector<1x128x128xf32>
    %49 = vector.shape_cast %48 : vector<1x128x128xf32> to vector<128x128xf32>
    %cst_33 = arith.constant dense<0.000000e+00> : vector<8x128xf32>
    %50 = tpu.matmul %47, %49, %cst_33 {dimension_numbers = #tpu.dot_dimension_numbers<[1], [0], [0], [1], [0, 0, 1, 1], [], []>} : vector<8x128xf32>, vector<128x128xf32>, vector<8x128xf32> -> vector<8x128xf32>
    %c3_34 = arith.constant 3 : index
    %c0_35 = arith.constant 0 : index
    %c0_36 = arith.constant 0 : index
    %51 = vector.load %arg3[%c3_34, %c0_35, %c0_36] : memref<15x1x128xf32, #tpu.memory_space<vmem>>, vector<1x1x128xf32>
    %52 = vector.shape_cast %51 : vector<1x1x128xf32> to vector<1x128xf32>
    %53 = vector.broadcast %52 : vector<1x128xf32> to vector<8x128xf32>
    %54 = arith.addf %50, %53 : vector<8x128xf32>
    %cst_37 = arith.constant 0.000000e+00 : f32
    %55 = vector.broadcast %cst_37 : f32 to vector<8x128xf32>
    %56 = arith.maximumf %54, %55 : vector<8x128xf32>
    %c4 = arith.constant 4 : index
    %c0_38 = arith.constant 0 : index
    %c0_39 = arith.constant 0 : index
    %57 = vector.load %arg2[%c4, %c0_38, %c0_39] : memref<15x128x128xf32, #tpu.memory_space<vmem>>, vector<1x128x128xf32>
    %58 = vector.shape_cast %57 : vector<1x128x128xf32> to vector<128x128xf32>
    %cst_40 = arith.constant dense<0.000000e+00> : vector<8x128xf32>
    %59 = tpu.matmul %56, %58, %cst_40 {dimension_numbers = #tpu.dot_dimension_numbers<[1], [0], [0], [1], [0, 0, 1, 1], [], []>} : vector<8x128xf32>, vector<128x128xf32>, vector<8x128xf32> -> vector<8x128xf32>
    %c4_41 = arith.constant 4 : index
    %c0_42 = arith.constant 0 : index
    %c0_43 = arith.constant 0 : index
    %60 = vector.load %arg3[%c4_41, %c0_42, %c0_43] : memref<15x1x128xf32, #tpu.memory_space<vmem>>, vector<1x1x128xf32>
    %61 = vector.shape_cast %60 : vector<1x1x128xf32> to vector<1x128xf32>
    %62 = vector.broadcast %61 : vector<1x128xf32> to vector<8x128xf32>
    %63 = arith.addf %59, %62 : vector<8x128xf32>
    %cst_44 = arith.constant 0.000000e+00 : f32
    %64 = vector.broadcast %cst_44 : f32 to vector<8x128xf32>
    %65 = arith.maximumf %63, %64 : vector<8x128xf32>
    %c5 = arith.constant 5 : index
    %c0_45 = arith.constant 0 : index
    %c0_46 = arith.constant 0 : index
    %66 = vector.load %arg2[%c5, %c0_45, %c0_46] : memref<15x128x128xf32, #tpu.memory_space<vmem>>, vector<1x128x128xf32>
    %67 = vector.shape_cast %66 : vector<1x128x128xf32> to vector<128x128xf32>
    %cst_47 = arith.constant dense<0.000000e+00> : vector<8x128xf32>
    %68 = tpu.matmul %65, %67, %cst_47 {dimension_numbers = #tpu.dot_dimension_numbers<[1], [0], [0], [1], [0, 0, 1, 1], [], []>} : vector<8x128xf32>, vector<128x128xf32>, vector<8x128xf32> -> vector<8x128xf32>
    %c5_48 = arith.constant 5 : index
    %c0_49 = arith.constant 0 : index
    %c0_50 = arith.constant 0 : index
    %69 = vector.load %arg3[%c5_48, %c0_49, %c0_50] : memref<15x1x128xf32, #tpu.memory_space<vmem>>, vector<1x1x128xf32>
    %70 = vector.shape_cast %69 : vector<1x1x128xf32> to vector<1x128xf32>
    %71 = vector.broadcast %70 : vector<1x128xf32> to vector<8x128xf32>
    %72 = arith.addf %68, %71 : vector<8x128xf32>
    %73 = math.tanh %72 : vector<8x128xf32>
    %cst_51 = arith.constant 1.000000e-01 : f32
    %74 = vector.broadcast %cst_51 : f32 to vector<8x128xf32>
    %75 = arith.mulf %74, %73 : vector<8x128xf32>
    %cst_52 = arith.constant 0.000000e+00 : f32
    %76 = vector.broadcast %cst_52 : f32 to vector<8x128xf32>
    %77 = arith.select %7, %75, %76 : vector<8x128xi1>, vector<8x128xf32>
    %cst_53 = arith.constant dense<0.000000e+00> : vector<8xf32>
    %78 = vector.multi_reduction <add>, %77, %cst_53 [1] : vector<8x128xf32> to vector<8xf32>
    %79 = vector.shape_cast %78 : vector<8xf32> to vector<8x1xf32>
    %cst_54 = arith.constant 0.000000e+00 : f32
    %80 = vector.broadcast %cst_54 : f32 to vector<8x1xf32>
    %81 = arith.subf %80, %79 : vector<8x1xf32>
    %82 = vector.shape_cast %81 : vector<8x1xf32> to vector<8x1xf32>
    %83 = vector.broadcast %82 : vector<8x1xf32> to vector<8x128xf32>
    %84 = arith.select %9, %83, %77 : vector<8x128xi1>, vector<8x128xf32>
    %85 = math.exp %84 : vector<8x128xf32>
    %86 = arith.mulf %45, %85 : vector<8x128xf32>
    %87 = arith.truncf %86 : vector<8x128xf32> to vector<8x128xbf16>
    %88 = arith.extf %87 : vector<8x128xbf16> to vector<8x128xf32>
    %89 = arith.subf %86, %88 : vector<8x128xf32>
    %cst_55 = arith.constant dense<0.000000e+00> : vector<8x128xf32>
    %90 = tpu.matmul %88, %37, %cst_55 {dimension_numbers = #tpu.dot_dimension_numbers<[1], [0], [0], [1], [0, 0, 1, 1], [], []>} : vector<8x128xf32>, vector<128x128xf32>, vector<8x128xf32> -> vector<8x128xf32>
    %cst_56 = arith.constant dense<0.000000e+00> : vector<8x128xf32>
    %91 = tpu.matmul %89, %37, %cst_56 {dimension_numbers = #tpu.dot_dimension_numbers<[1], [0], [0], [1], [0, 0, 1, 1], [], []>} : vector<8x128xf32>, vector<128x128xf32>, vector<8x128xf32> -> vector<8x128xf32>
    %92 = arith.addf %90, %91 : vector<8x128xf32>
    %cst_57 = arith.constant 0.000000e+00 : f32
    %93 = vector.broadcast %cst_57 : f32 to vector<8x128xf32>
    %94 = arith.select %2, %72, %93 : vector<8x128xi1>, vector<8x128xf32>
    %95 = arith.addf %92, %94 : vector<8x128xf32>
    %cst_58 = arith.constant 0.000000e+00 : f32
    %96 = vector.broadcast %cst_58 : f32 to vector<8x128xf32>
    %97 = arith.select %2, %95, %96 : vector<8x128xi1>, vector<8x128xf32>
    %c6 = arith.constant 6 : index
    %c0_59 = arith.constant 0 : index
    %c0_60 = arith.constant 0 : index
    %98 = vector.load %arg2[%c6, %c0_59, %c0_60] : memref<15x128x128xf32, #tpu.memory_space<vmem>>, vector<1x128x128xf32>
    %99 = vector.shape_cast %98 : vector<1x128x128xf32> to vector<128x128xf32>
    %cst_61 = arith.constant dense<0.000000e+00> : vector<8x128xf32>
    %100 = tpu.matmul %97, %99, %cst_61 {dimension_numbers = #tpu.dot_dimension_numbers<[1], [0], [0], [1], [0, 0, 1, 1], [], []>} : vector<8x128xf32>, vector<128x128xf32>, vector<8x128xf32> -> vector<8x128xf32>
    %c6_62 = arith.constant 6 : index
    %c0_63 = arith.constant 0 : index
    %c0_64 = arith.constant 0 : index
    %101 = vector.load %arg3[%c6_62, %c0_63, %c0_64] : memref<15x1x128xf32, #tpu.memory_space<vmem>>, vector<1x1x128xf32>
    %102 = vector.shape_cast %101 : vector<1x1x128xf32> to vector<1x128xf32>
    %103 = vector.broadcast %102 : vector<1x128xf32> to vector<8x128xf32>
    %104 = arith.addf %100, %103 : vector<8x128xf32>
    %cst_65 = arith.constant 0.000000e+00 : f32
    %105 = vector.broadcast %cst_65 : f32 to vector<8x128xf32>
    %106 = arith.maximumf %104, %105 : vector<8x128xf32>
    %c7 = arith.constant 7 : index
    %c0_66 = arith.constant 0 : index
    %c0_67 = arith.constant 0 : index
    %107 = vector.load %arg2[%c7, %c0_66, %c0_67] : memref<15x128x128xf32, #tpu.memory_space<vmem>>, vector<1x128x128xf32>
    %108 = vector.shape_cast %107 : vector<1x128x128xf32> to vector<128x128xf32>
    %cst_68 = arith.constant dense<0.000000e+00> : vector<8x128xf32>
    %109 = tpu.matmul %106, %108, %cst_68 {dimension_numbers = #tpu.dot_dimension_numbers<[1], [0], [0], [1], [0, 0, 1, 1], [], []>} : vector<8x128xf32>, vector<128x128xf32>, vector<8x128xf32> -> vector<8x128xf32>
    %c7_69 = arith.constant 7 : index
    %c0_70 = arith.constant 0 : index
    %c0_71 = arith.constant 0 : index
    %110 = vector.load %arg3[%c7_69, %c0_70, %c0_71] : memref<15x1x128xf32, #tpu.memory_space<vmem>>, vector<1x1x128xf32>
    %111 = vector.shape_cast %110 : vector<1x1x128xf32> to vector<1x128xf32>
    %112 = vector.broadcast %111 : vector<1x128xf32> to vector<8x128xf32>
    %113 = arith.addf %109, %112 : vector<8x128xf32>
    %cst_72 = arith.constant 0.000000e+00 : f32
    %114 = vector.broadcast %cst_72 : f32 to vector<8x128xf32>
    %115 = arith.maximumf %113, %114 : vector<8x128xf32>
    %c8 = arith.constant 8 : index
    %c0_73 = arith.constant 0 : index
    %c0_74 = arith.constant 0 : index
    %116 = vector.load %arg2[%c8, %c0_73, %c0_74] : memref<15x128x128xf32, #tpu.memory_space<vmem>>, vector<1x128x128xf32>
    %117 = vector.shape_cast %116 : vector<1x128x128xf32> to vector<128x128xf32>
    %cst_75 = arith.constant dense<0.000000e+00> : vector<8x128xf32>
    %118 = tpu.matmul %115, %117, %cst_75 {dimension_numbers = #tpu.dot_dimension_numbers<[1], [0], [0], [1], [0, 0, 1, 1], [], []>} : vector<8x128xf32>, vector<128x128xf32>, vector<8x128xf32> -> vector<8x128xf32>
    %c8_76 = arith.constant 8 : index
    %c0_77 = arith.constant 0 : index
    %c0_78 = arith.constant 0 : index
    %119 = vector.load %arg3[%c8_76, %c0_77, %c0_78] : memref<15x1x128xf32, #tpu.memory_space<vmem>>, vector<1x1x128xf32>
    %120 = vector.shape_cast %119 : vector<1x1x128xf32> to vector<1x128xf32>
    %121 = vector.broadcast %120 : vector<1x128xf32> to vector<8x128xf32>
    %122 = arith.addf %118, %121 : vector<8x128xf32>
    %123 = math.tanh %122 : vector<8x128xf32>
    %cst_79 = arith.constant 1.000000e-01 : f32
    %124 = vector.broadcast %cst_79 : f32 to vector<8x128xf32>
    %125 = arith.mulf %124, %123 : vector<8x128xf32>
    %cst_80 = arith.constant 0.000000e+00 : f32
    %126 = vector.broadcast %cst_80 : f32 to vector<8x128xf32>
    %127 = arith.select %7, %125, %126 : vector<8x128xi1>, vector<8x128xf32>
    %cst_81 = arith.constant dense<0.000000e+00> : vector<8xf32>
    %128 = vector.multi_reduction <add>, %127, %cst_81 [1] : vector<8x128xf32> to vector<8xf32>
    %129 = vector.shape_cast %128 : vector<8xf32> to vector<8x1xf32>
    %cst_82 = arith.constant 0.000000e+00 : f32
    %130 = vector.broadcast %cst_82 : f32 to vector<8x1xf32>
    %131 = arith.subf %130, %129 : vector<8x1xf32>
    %132 = vector.shape_cast %131 : vector<8x1xf32> to vector<8x1xf32>
    %133 = vector.broadcast %132 : vector<8x1xf32> to vector<8x128xf32>
    %134 = arith.select %9, %133, %127 : vector<8x128xi1>, vector<8x128xf32>
    %135 = math.exp %134 : vector<8x128xf32>
    %136 = arith.mulf %95, %135 : vector<8x128xf32>
    %137 = arith.truncf %136 : vector<8x128xf32> to vector<8x128xbf16>
    %138 = arith.extf %137 : vector<8x128xbf16> to vector<8x128xf32>
    %139 = arith.subf %136, %138 : vector<8x128xf32>
    %cst_83 = arith.constant dense<0.000000e+00> : vector<8x128xf32>
    %140 = tpu.matmul %138, %37, %cst_83 {dimension_numbers = #tpu.dot_dimension_numbers<[1], [0], [0], [1], [0, 0, 1, 1], [], []>} : vector<8x128xf32>, vector<128x128xf32>, vector<8x128xf32> -> vector<8x128xf32>
    %cst_84 = arith.constant dense<0.000000e+00> : vector<8x128xf32>
    %141 = tpu.matmul %139, %37, %cst_84 {dimension_numbers = #tpu.dot_dimension_numbers<[1], [0], [0], [1], [0, 0, 1, 1], [], []>} : vector<8x128xf32>, vector<128x128xf32>, vector<8x128xf32> -> vector<8x128xf32>
    %142 = arith.addf %140, %141 : vector<8x128xf32>
    %cst_85 = arith.constant 0.000000e+00 : f32
    %143 = vector.broadcast %cst_85 : f32 to vector<8x128xf32>
    %144 = arith.select %2, %122, %143 : vector<8x128xi1>, vector<8x128xf32>
    %145 = arith.addf %142, %144 : vector<8x128xf32>
    %c1_86 = arith.constant 1 : index
    %c0_87 = arith.constant 0 : index
    %c0_88 = arith.constant 0 : index
    %146 = vector.load %arg4[%c1_86, %c0_87, %c0_88] : memref<2x128x128xf32, #tpu.memory_space<vmem>>, vector<1x128x128xf32>
    %147 = vector.shape_cast %146 : vector<1x128x128xf32> to vector<128x128xf32>
    %148 = arith.truncf %145 : vector<8x128xf32> to vector<8x128xbf16>
    %149 = arith.extf %148 : vector<8x128xbf16> to vector<8x128xf32>
    %150 = arith.subf %145, %149 : vector<8x128xf32>
    %cst_89 = arith.constant dense<0.000000e+00> : vector<8x128xf32>
    %151 = tpu.matmul %149, %147, %cst_89 {dimension_numbers = #tpu.dot_dimension_numbers<[1], [0], [0], [1], [0, 0, 1, 1], [], []>} : vector<8x128xf32>, vector<128x128xf32>, vector<8x128xf32> -> vector<8x128xf32>
    %cst_90 = arith.constant dense<0.000000e+00> : vector<8x128xf32>
    %152 = tpu.matmul %150, %147, %cst_90 {dimension_numbers = #tpu.dot_dimension_numbers<[1], [0], [0], [1], [0, 0, 1, 1], [], []>} : vector<8x128xf32>, vector<128x128xf32>, vector<8x128xf32> -> vector<8x128xf32>
    %153 = arith.addf %151, %152 : vector<8x128xf32>
    %cst_91 = arith.constant 0.000000e+00 : f32
    %154 = vector.broadcast %cst_91 : f32 to vector<8x128xf32>
    %155 = arith.select %2, %153, %154 : vector<8x128xi1>, vector<8x128xf32>
    %c9 = arith.constant 9 : index
    %c0_92 = arith.constant 0 : index
    %c0_93 = arith.constant 0 : index
    %156 = vector.load %arg2[%c9, %c0_92, %c0_93] : memref<15x128x128xf32, #tpu.memory_space<vmem>>, vector<1x128x128xf32>
    %157 = vector.shape_cast %156 : vector<1x128x128xf32> to vector<128x128xf32>
    %cst_94 = arith.constant dense<0.000000e+00> : vector<8x128xf32>
    %158 = tpu.matmul %155, %157, %cst_94 {dimension_numbers = #tpu.dot_dimension_numbers<[1], [0], [0], [1], [0, 0, 1, 1], [], []>} : vector<8x128xf32>, vector<128x128xf32>, vector<8x128xf32> -> vector<8x128xf32>
    %c9_95 = arith.constant 9 : index
    %c0_96 = arith.constant 0 : index
    %c0_97 = arith.constant 0 : index
    %159 = vector.load %arg3[%c9_95, %c0_96, %c0_97] : memref<15x1x128xf32, #tpu.memory_space<vmem>>, vector<1x1x128xf32>
    %160 = vector.shape_cast %159 : vector<1x1x128xf32> to vector<1x128xf32>
    %161 = vector.broadcast %160 : vector<1x128xf32> to vector<8x128xf32>
    %162 = arith.addf %158, %161 : vector<8x128xf32>
    %cst_98 = arith.constant 0.000000e+00 : f32
    %163 = vector.broadcast %cst_98 : f32 to vector<8x128xf32>
    %164 = arith.maximumf %162, %163 : vector<8x128xf32>
    %c10 = arith.constant 10 : index
    %c0_99 = arith.constant 0 : index
    %c0_100 = arith.constant 0 : index
    %165 = vector.load %arg2[%c10, %c0_99, %c0_100] : memref<15x128x128xf32, #tpu.memory_space<vmem>>, vector<1x128x128xf32>
    %166 = vector.shape_cast %165 : vector<1x128x128xf32> to vector<128x128xf32>
    %cst_101 = arith.constant dense<0.000000e+00> : vector<8x128xf32>
    %167 = tpu.matmul %164, %166, %cst_101 {dimension_numbers = #tpu.dot_dimension_numbers<[1], [0], [0], [1], [0, 0, 1, 1], [], []>} : vector<8x128xf32>, vector<128x128xf32>, vector<8x128xf32> -> vector<8x128xf32>
    %c10_102 = arith.constant 10 : index
    %c0_103 = arith.constant 0 : index
    %c0_104 = arith.constant 0 : index
    %168 = vector.load %arg3[%c10_102, %c0_103, %c0_104] : memref<15x1x128xf32, #tpu.memory_space<vmem>>, vector<1x1x128xf32>
    %169 = vector.shape_cast %168 : vector<1x1x128xf32> to vector<1x128xf32>
    %170 = vector.broadcast %169 : vector<1x128xf32> to vector<8x128xf32>
    %171 = arith.addf %167, %170 : vector<8x128xf32>
    %cst_105 = arith.constant 0.000000e+00 : f32
    %172 = vector.broadcast %cst_105 : f32 to vector<8x128xf32>
    %173 = arith.maximumf %171, %172 : vector<8x128xf32>
    %c11 = arith.constant 11 : index
    %c0_106 = arith.constant 0 : index
    %c0_107 = arith.constant 0 : index
    %174 = vector.load %arg2[%c11, %c0_106, %c0_107] : memref<15x128x128xf32, #tpu.memory_space<vmem>>, vector<1x128x128xf32>
    %175 = vector.shape_cast %174 : vector<1x128x128xf32> to vector<128x128xf32>
    %cst_108 = arith.constant dense<0.000000e+00> : vector<8x128xf32>
    %176 = tpu.matmul %173, %175, %cst_108 {dimension_numbers = #tpu.dot_dimension_numbers<[1], [0], [0], [1], [0, 0, 1, 1], [], []>} : vector<8x128xf32>, vector<128x128xf32>, vector<8x128xf32> -> vector<8x128xf32>
    %c11_109 = arith.constant 11 : index
    %c0_110 = arith.constant 0 : index
    %c0_111 = arith.constant 0 : index
    %177 = vector.load %arg3[%c11_109, %c0_110, %c0_111] : memref<15x1x128xf32, #tpu.memory_space<vmem>>, vector<1x1x128xf32>
    %178 = vector.shape_cast %177 : vector<1x1x128xf32> to vector<1x128xf32>
    %179 = vector.broadcast %178 : vector<1x128xf32> to vector<8x128xf32>
    %180 = arith.addf %176, %179 : vector<8x128xf32>
    %181 = math.tanh %180 : vector<8x128xf32>
    %cst_112 = arith.constant 1.000000e-01 : f32
    %182 = vector.broadcast %cst_112 : f32 to vector<8x128xf32>
    %183 = arith.mulf %182, %181 : vector<8x128xf32>
    %cst_113 = arith.constant 0.000000e+00 : f32
    %184 = vector.broadcast %cst_113 : f32 to vector<8x128xf32>
    %185 = arith.select %7, %183, %184 : vector<8x128xi1>, vector<8x128xf32>
    %cst_114 = arith.constant dense<0.000000e+00> : vector<8xf32>
    %186 = vector.multi_reduction <add>, %185, %cst_114 [1] : vector<8x128xf32> to vector<8xf32>
    %187 = vector.shape_cast %186 : vector<8xf32> to vector<8x1xf32>
    %cst_115 = arith.constant 0.000000e+00 : f32
    %188 = vector.broadcast %cst_115 : f32 to vector<8x1xf32>
    %189 = arith.subf %188, %187 : vector<8x1xf32>
    %190 = vector.shape_cast %189 : vector<8x1xf32> to vector<8x1xf32>
    %191 = vector.broadcast %190 : vector<8x1xf32> to vector<8x128xf32>
    %192 = arith.select %9, %191, %185 : vector<8x128xi1>, vector<8x128xf32>
    %193 = math.exp %192 : vector<8x128xf32>
    %194 = arith.mulf %153, %193 : vector<8x128xf32>
    %195 = arith.truncf %194 : vector<8x128xf32> to vector<8x128xbf16>
    %196 = arith.extf %195 : vector<8x128xbf16> to vector<8x128xf32>
    %197 = arith.subf %194, %196 : vector<8x128xf32>
    %cst_116 = arith.constant dense<0.000000e+00> : vector<8x128xf32>
    %198 = tpu.matmul %196, %37, %cst_116 {dimension_numbers = #tpu.dot_dimension_numbers<[1], [0], [0], [1], [0, 0, 1, 1], [], []>} : vector<8x128xf32>, vector<128x128xf32>, vector<8x128xf32> -> vector<8x128xf32>
    %cst_117 = arith.constant dense<0.000000e+00> : vector<8x128xf32>
    %199 = tpu.matmul %197, %37, %cst_117 {dimension_numbers = #tpu.dot_dimension_numbers<[1], [0], [0], [1], [0, 0, 1, 1], [], []>} : vector<8x128xf32>, vector<128x128xf32>, vector<8x128xf32> -> vector<8x128xf32>
    %200 = arith.addf %198, %199 : vector<8x128xf32>
    %cst_118 = arith.constant 0.000000e+00 : f32
    %201 = vector.broadcast %cst_118 : f32 to vector<8x128xf32>
    %202 = arith.select %2, %180, %201 : vector<8x128xi1>, vector<8x128xf32>
    %203 = arith.addf %200, %202 : vector<8x128xf32>
    %cst_119 = arith.constant 0.000000e+00 : f32
    %204 = vector.broadcast %cst_119 : f32 to vector<8x128xf32>
    %205 = arith.select %2, %203, %204 : vector<8x128xi1>, vector<8x128xf32>
    %c12 = arith.constant 12 : index
    %c0_120 = arith.constant 0 : index
    %c0_121 = arith.constant 0 : index
    %206 = vector.load %arg2[%c12, %c0_120, %c0_121] : memref<15x128x128xf32, #tpu.memory_space<vmem>>, vector<1x128x128xf32>
    %207 = vector.shape_cast %206 : vector<1x128x128xf32> to vector<128x128xf32>
    %cst_122 = arith.constant dense<0.000000e+00> : vector<8x128xf32>
    %208 = tpu.matmul %205, %207, %cst_122 {dimension_numbers = #tpu.dot_dimension_numbers<[1], [0], [0], [1], [0, 0, 1, 1], [], []>} : vector<8x128xf32>, vector<128x128xf32>, vector<8x128xf32> -> vector<8x128xf32>
    %c12_123 = arith.constant 12 : index
    %c0_124 = arith.constant 0 : index
    %c0_125 = arith.constant 0 : index
    %209 = vector.load %arg3[%c12_123, %c0_124, %c0_125] : memref<15x1x128xf32, #tpu.memory_space<vmem>>, vector<1x1x128xf32>
    %210 = vector.shape_cast %209 : vector<1x1x128xf32> to vector<1x128xf32>
    %211 = vector.broadcast %210 : vector<1x128xf32> to vector<8x128xf32>
    %212 = arith.addf %208, %211 : vector<8x128xf32>
    %cst_126 = arith.constant 0.000000e+00 : f32
    %213 = vector.broadcast %cst_126 : f32 to vector<8x128xf32>
    %214 = arith.maximumf %212, %213 : vector<8x128xf32>
    %c13 = arith.constant 13 : index
    %c0_127 = arith.constant 0 : index
    %c0_128 = arith.constant 0 : index
    %215 = vector.load %arg2[%c13, %c0_127, %c0_128] : memref<15x128x128xf32, #tpu.memory_space<vmem>>, vector<1x128x128xf32>
    %216 = vector.shape_cast %215 : vector<1x128x128xf32> to vector<128x128xf32>
    %cst_129 = arith.constant dense<0.000000e+00> : vector<8x128xf32>
    %217 = tpu.matmul %214, %216, %cst_129 {dimension_numbers = #tpu.dot_dimension_numbers<[1], [0], [0], [1], [0, 0, 1, 1], [], []>} : vector<8x128xf32>, vector<128x128xf32>, vector<8x128xf32> -> vector<8x128xf32>
    %c13_130 = arith.constant 13 : index
    %c0_131 = arith.constant 0 : index
    %c0_132 = arith.constant 0 : index
    %218 = vector.load %arg3[%c13_130, %c0_131, %c0_132] : memref<15x1x128xf32, #tpu.memory_space<vmem>>, vector<1x1x128xf32>
    %219 = vector.shape_cast %218 : vector<1x1x128xf32> to vector<1x128xf32>
    %220 = vector.broadcast %219 : vector<1x128xf32> to vector<8x128xf32>
    %221 = arith.addf %217, %220 : vector<8x128xf32>
    %cst_133 = arith.constant 0.000000e+00 : f32
    %222 = vector.broadcast %cst_133 : f32 to vector<8x128xf32>
    %223 = arith.maximumf %221, %222 : vector<8x128xf32>
    %c14 = arith.constant 14 : index
    %c0_134 = arith.constant 0 : index
    %c0_135 = arith.constant 0 : index
    %224 = vector.load %arg2[%c14, %c0_134, %c0_135] : memref<15x128x128xf32, #tpu.memory_space<vmem>>, vector<1x128x128xf32>
    %225 = vector.shape_cast %224 : vector<1x128x128xf32> to vector<128x128xf32>
    %cst_136 = arith.constant dense<0.000000e+00> : vector<8x128xf32>
    %226 = tpu.matmul %223, %225, %cst_136 {dimension_numbers = #tpu.dot_dimension_numbers<[1], [0], [0], [1], [0, 0, 1, 1], [], []>} : vector<8x128xf32>, vector<128x128xf32>, vector<8x128xf32> -> vector<8x128xf32>
    %c14_137 = arith.constant 14 : index
    %c0_138 = arith.constant 0 : index
    %c0_139 = arith.constant 0 : index
    %227 = vector.load %arg3[%c14_137, %c0_138, %c0_139] : memref<15x1x128xf32, #tpu.memory_space<vmem>>, vector<1x1x128xf32>
    %228 = vector.shape_cast %227 : vector<1x1x128xf32> to vector<1x128xf32>
    %229 = vector.broadcast %228 : vector<1x128xf32> to vector<8x128xf32>
    %230 = arith.addf %226, %229 : vector<8x128xf32>
    %231 = math.tanh %230 : vector<8x128xf32>
    %cst_140 = arith.constant 1.000000e-01 : f32
    %232 = vector.broadcast %cst_140 : f32 to vector<8x128xf32>
    %233 = arith.mulf %232, %231 : vector<8x128xf32>
    %cst_141 = arith.constant 0.000000e+00 : f32
    %234 = vector.broadcast %cst_141 : f32 to vector<8x128xf32>
    %235 = arith.select %7, %233, %234 : vector<8x128xi1>, vector<8x128xf32>
    %cst_142 = arith.constant dense<0.000000e+00> : vector<8xf32>
    %236 = vector.multi_reduction <add>, %235, %cst_142 [1] : vector<8x128xf32> to vector<8xf32>
    %237 = vector.shape_cast %236 : vector<8xf32> to vector<8x1xf32>
    %cst_143 = arith.constant 0.000000e+00 : f32
    %238 = vector.broadcast %cst_143 : f32 to vector<8x1xf32>
    %239 = arith.subf %238, %237 : vector<8x1xf32>
    %240 = vector.shape_cast %239 : vector<8x1xf32> to vector<8x1xf32>
    %241 = vector.broadcast %240 : vector<8x1xf32> to vector<8x128xf32>
    %242 = arith.select %9, %241, %235 : vector<8x128xi1>, vector<8x128xf32>
    %243 = math.exp %242 : vector<8x128xf32>
    %244 = arith.mulf %203, %243 : vector<8x128xf32>
    %245 = arith.truncf %244 : vector<8x128xf32> to vector<8x128xbf16>
    %246 = arith.extf %245 : vector<8x128xbf16> to vector<8x128xf32>
    %247 = arith.subf %244, %246 : vector<8x128xf32>
    %cst_144 = arith.constant dense<0.000000e+00> : vector<8x128xf32>
    %248 = tpu.matmul %246, %37, %cst_144 {dimension_numbers = #tpu.dot_dimension_numbers<[1], [0], [0], [1], [0, 0, 1, 1], [], []>} : vector<8x128xf32>, vector<128x128xf32>, vector<8x128xf32> -> vector<8x128xf32>
    %cst_145 = arith.constant dense<0.000000e+00> : vector<8x128xf32>
    %249 = tpu.matmul %247, %37, %cst_145 {dimension_numbers = #tpu.dot_dimension_numbers<[1], [0], [0], [1], [0, 0, 1, 1], [], []>} : vector<8x128xf32>, vector<128x128xf32>, vector<8x128xf32> -> vector<8x128xf32>
    %250 = arith.addf %248, %249 : vector<8x128xf32>
    %cst_146 = arith.constant 0.000000e+00 : f32
    %251 = vector.broadcast %cst_146 : f32 to vector<8x128xf32>
    %252 = arith.select %2, %230, %251 : vector<8x128xi1>, vector<8x128xf32>
    %253 = arith.addf %250, %252 : vector<8x128xf32>
    %cst_147 = arith.constant 0.000000e+00 : f32
    %254 = vector.broadcast %cst_147 : f32 to vector<8x128xf32>
    %255 = arith.maximumf %253, %254 : vector<8x128xf32>
    %256 = math.absf %253 : vector<8x128xf32>
    %cst_148 = arith.constant 0.000000e+00 : f32
    %257 = vector.broadcast %cst_148 : f32 to vector<8x128xf32>
    %258 = arith.subf %257, %256 : vector<8x128xf32>
    %259 = math.exp %258 : vector<8x128xf32>
    %cst_149 = arith.constant 1.000000e+00 : f32
    %260 = vector.broadcast %cst_149 : f32 to vector<8x128xf32>
    %261 = arith.addf %260, %259 : vector<8x128xf32>
    %262 = math.log %261 : vector<8x128xf32>
    %263 = arith.addf %255, %262 : vector<8x128xf32>
    %c0_150 = arith.constant 0 : index
    %c0_151 = arith.constant 0 : index
    %264 = vector.load %arg6[%c0_150, %c0_151] : memref<8x128xf32, #tpu.memory_space<vmem>>, vector<8x128xf32>
    tpu.vector_store %arg6[%c0_150, %c0_151], %263 {strides = array<i32>} : memref<8x128xf32, #tpu.memory_space<vmem>>, vector<8x128xf32>,
    return
  }
  func.func @transform_0(%arg0: i32) -> (i32, i32) {
    %c0_i32 = arith.constant 0 : i32
    %c0_i32_0 = arith.constant 0 : i32
    return %arg0, %c0_i32 : i32, i32
  }
  func.func @transform_1(%arg0: i32) -> (i32, i32, i32) {
    %c0_i32 = arith.constant 0 : i32
    %c0_i32_0 = arith.constant 0 : i32
    %c0_i32_1 = arith.constant 0 : i32
    %c0_i32_2 = arith.constant 0 : i32
    return %c0_i32, %c0_i32_0, %c0_i32_1 : i32, i32, i32
  }
  func.func @transform_2(%arg0: i32) -> (i32, i32, i32) {
    %c0_i32 = arith.constant 0 : i32
    %c0_i32_0 = arith.constant 0 : i32
    %c0_i32_1 = arith.constant 0 : i32
    %c0_i32_2 = arith.constant 0 : i32
    return %c0_i32, %c0_i32_0, %c0_i32_1 : i32, i32, i32
  }
  func.func @transform_3(%arg0: i32) -> (i32, i32, i32) {
    %c0_i32 = arith.constant 0 : i32
    %c0_i32_0 = arith.constant 0 : i32
    %c0_i32_1 = arith.constant 0 : i32
    %c0_i32_2 = arith.constant 0 : i32
    return %c0_i32, %c0_i32_0, %c0_i32_1 : i32, i32, i32
  }
  func.func @transform_4(%arg0: i32) -> (i32, i32) {
    %c0_i32 = arith.constant 0 : i32
    %c0_i32_0 = arith.constant 0 : i32
    %c0_i32_1 = arith.constant 0 : i32
    return %c0_i32, %c0_i32_0 : i32, i32
  }
  func.func @transform_5(%arg0: i32) -> (i32, i32) {
    %c0_i32 = arith.constant 0 : i32
    %c0_i32_0 = arith.constant 0 : i32
    return %arg0, %c0_i32 : i32, i32
  }
}

</mosaic_0001>

<bundles_post_ra>
// kernel: decoder_forward.1
= control target key start
LH: loop header
LB: loop body
LE: loop exit
PB: predicated region body
PF: predicated region fallthrough
CT: control target
= control target key end

     0   :  { %10 = vsyncpa [#allocation3], 0  ;;  %s5916_s0 = inlined_call_operand.vmem [shape: f32[16,128], index: 0, kind: input, shape index: {}]   ;;  %s5917_s1 = inlined_call_operand.hbm [shape: f32[15,128,128], index: 1, kind: input, shape index: {}]   ;;  %s5918_s2 = inlined_call_operand.vmem [shape: f32[15,1,128], index: 2, kind: input, shape index: {}]   ;;  %s5919_s3 = inlined_call_operand.hbm [shape: f32[2,128,128], index: 3, kind: input, shape index: {}]   ;;  %s5920_s4 = inlined_call_operand.hbm [shape: f32[128,128], index: 4, kind: input, shape index: {}]   ;;  %s5921_s5 = inlined_call_operand.hbm [shape: f32[16,128], index: 5, kind: output, shape index: {}]  }
   0x1   :  { %11 = vsyncpa [#allocation6], 0 }
   0x2   :  { %12 = vsyncpa [#allocation4], 0 }
   0x3   :  { %14 = vsyncpa [#allocation4 + $0x1], 0  ;;  %s5174_s18 = smov 0   ;;  %s5176_s19 = smov 0  }
   0x4   :  { %s5178_s20 = smov 0   ;;  %s5180_s21 = smov 0  }
   0x5 LB: > { %s5195_s22 = sadd.s32 4294967295, %s5133_s21   ;;  %s2779_s23 = sadd.s32 4294967294, %s5133_s21   ;;  %s5133_s21 = sphi %s5180_s21, %s5944_s21   ;;  %s5129_s20 = sphi %s5178_s20, %s5943_s20   ;;  %s5125_s19 = sphi %s5176_s19, %s5942_s19   ;;  %s5121_s18 = sphi %s5174_s18, %s5941_s18  }
   0x6   : > { %s5199_s24 = sadd.s32 1, %s5133_s21   ;;  %s137_s25 = sadd.s32 1, %s5129_s20 }
   0x7   : > { %s134_s26 = ssub.s32 %s5133_s21, %s5199_s24  ;;  %p147_p0 = scmp.ne.s32.totalorder %s5129_s20, %s5125_s19 }
   0x8   : > { %p135_p1 = scmp.eq.s32.totalorder %s134_s26, 0  ;;  %p148_p2 = scmp.eq.s32.totalorder %s5195_s22, 1 }
   0x9   : > { %p153_p3 = scmp.ne.s32.totalorder %s5125_s19, %s5121_s18  ;;  %p154_p4 = scmp.eq.s32.totalorder %s2779_s23, 1 }
   0xa   : > { %s5210_s27 = scalar_select %p135_p1, %s5129_s20, %s137_s25  }
   0xb   : > { %p5212_p5 = por %p148_p2, %p147_p0  ;;  %p5216_p6 = por %p154_p4, %p153_p3 }
   0xc   : > { %5925 = sst [smem:[#allocation12_spill]] %s5210_s27  ;;  %p2780_p7 = scmp.ge.s32.totalorder %s5133_s21, 1 }
   0xd   : > { %s5926_s28 = scalar_select %p5212_p5, 1, 0 }
   0xe   : > { %s5927_s29 = scalar_select %p5216_p6, 1, 0 }
   0xf   : > { %p161_p8 = scmp.lt.s32.totalorder %s5133_s21, 3  ;;  %p5922_p9 = scmp.eq.s32.totalorder %s5195_s22, 0 }
  0x10   : > { %s5135_s6 = smov [#allocation5]   ;;  %s5136_s9 = smov [#allocation2]  }
  0x11   : > { %p5223_p10 = pnand %p2780_p7, %p161_p8  ;;  %s189_s7 = sshll.u32 %s5135_s6, 4  ;;  %s5229_s7 = int_to_ptr.vmem [resolvable:$true] %s189_s7 }
  0x12   : > { %s173_s10 = sshll.u32 %s5136_s9, 4  ;;  %s5137_s11 = smov [#allocation7]   ;;  %s5237_s10 = int_to_ptr.vmem [resolvable:$true] %s173_s10 }
  0x13   : > { %s5928_s30 = scalar_select %p5223_p10, 1, 0 }
  0x14   : > { %p4898_p11 = pneg %p5223_p10  ;;  %s5239_s12 = sshll.u32 %s5137_s11, 4  ;;  %s203_s12 = int_to_ptr.vmem [resolvable:$true] %s5239_s12 }
  0x15   : > { %s4979_s15 = scalar_lea.hbm %s5919_s3, 4096 }
  0x16   : > { %p5233_p12 = pnand %p5922_p9, %p4898_p11  ;;  %p4980_p13 = scmp.ne.s32.totalorder %s5919_s3, %s4979_s15 }
  0x17   : > { %p4986_p3 = scmp.lt.u32.totalorder %s4979_s15, %s5919_s3 }
  0x18   : > { %p5249_p0 = pneg %p5233_p12 }
  0x1a   : > { %p4982_p1 = pnand %p5249_p0, %p4980_p13 }
  0x1c   : > { %p4983_p2 = pneg %p4982_p1 }
  0x1e   : > { %p4988_p4 = pnand %p4986_p3, %p4983_p2 }
  0x20   : > { %4991 = shalt.err (!%p4988_p4)
}
  0x21   : > { %s4992_s6 = scalar_lea.vmem %s5229_s7, 4096  ;;  %p5000_p9 = scmp.lt.s32.totalorder %s5229_s7, %s5229_s7 }
  0x22   : > { %p4993_p7 = scmp.ne.s32.totalorder %s5229_s7, %s4992_s6  ;;  %p5001_p6 = scmp.lt.s32.totalorder %s4992_s6, %s4992_s6 }
  0x24   : > { %p4995_p8 = pnand %p4993_p7, %p5249_p0  ;;  %p5002_p13 = por %p5001_p6, %p5000_p9 }
  0x26   : > { %p4996_p11 = pneg %p4995_p8 }
  0x28   : > { %p5003_p1 = pnand %p5002_p13, %p4996_p11 }
  0x2a   : > { %5006 = shalt.err (!%p5003_p1)
}
  0x2b   : > { %s5138_s9 = smov 128   ;;  %s5139_s11 = smov 8  }
  0x2c   : > { %4904 = dma.hbm_to_vmem [thread:$0]  (!%p5233_p12), %s5919_s3, 4096, %s5229_s7, [#allocation6], %s5138_s9, %s5138_s9, %s5139_s11  }
  0x2d   : > { %s5007_s17 = scalar_lea.hbm %s5917_s1, 30720 }
  0x2e   : > { %p5008_p6 = scmp.ne.s32.totalorder %s5917_s1, %s5007_s17  ;;  %p5014_p3 = scmp.lt.u32.totalorder %s5007_s17, %s5917_s1 }
  0x30   : > { %p5010_p9 = pnand %p5008_p6, %p5249_p0 }
  0x32   : > { %p5011_p2 = pneg %p5010_p9 }
  0x34   : > { %p5016_p4 = pnand %p5014_p3, %p5011_p2 }
  0x36   : > { %5019 = shalt.err (!%p5016_p4)
}
  0x37   : > { %s5020_s7 = scalar_lea.vmem %s5237_s10, 30720  ;;  %p5028_p13 = scmp.lt.s32.totalorder %s5237_s10, %s5237_s10 }
  0x38   : > { %p5021_p7 = scmp.ne.s32.totalorder %s5237_s10, %s5020_s7  ;;  %p5029_p1 = scmp.lt.s32.totalorder %s5020_s7, %s5020_s7 }
  0x3a   : > { %p5023_p8 = pnand %p5021_p7, %p5249_p0  ;;  %p5030_p6 = por %p5029_p1, %p5028_p13 }
  0x3c   : > { %p5024_p11 = pneg %p5023_p8 }
  0x3e   : > { %p5031_p9 = pnand %p5030_p6, %p5024_p11 }
  0x40   : > { %5034 = shalt.err (!%p5031_p9)
}
  0x41   : > { %4901 = dma.hbm_to_vmem [thread:$0]  (!%p5233_p12), %s5917_s1, 30720, %s5237_s10, [#allocation3], %s5138_s9, %s5138_s9, %s5139_s11  }
  0x42   : > { %s5035_s16 = scalar_lea.hbm %s5920_s4, 2048 }
  0x43   : > { %p5036_p2 = scmp.ne.s32.totalorder %s5920_s4, %s5035_s16  ;;  %p5042_p7 = scmp.lt.u32.totalorder %s5035_s16, %s5920_s4 }
  0x45   : > { %p5038_p3 = pnand %p5036_p2, %p5249_p0 }
  0x47   : > { %p5039_p4 = pneg %p5038_p3 }
  0x49   : > { %p5044_p8 = pnand %p5042_p7, %p5039_p4 }
  0x4b   : > { %5047 = shalt.err (!%p5044_p8)
}
  0x4c   : > { %s5048_s7 = scalar_lea.vmem %s203_s12, 2048  ;;  %p5056_p6 = scmp.lt.s32.totalorder %s203_s12, %s203_s12 }
  0x4d   : > { %p5049_p11 = scmp.ne.s32.totalorder %s203_s12, %s5048_s7  ;;  %p5057_p9 = scmp.lt.s32.totalorder %s5048_s7, %s5048_s7 }
  0x4f   : > { %p5051_p13 = pnand %p5049_p11, %p5249_p0  ;;  %p5058_p5 = por %p5057_p9, %p5056_p6 }
  0x51   : > { %p5052_p1 = pneg %p5051_p13 }
  0x53   : > { %p5059_p10 = pnand %p5058_p5, %p5052_p1 }
  0x55   : > { %5062 = shalt.err (!%p5059_p10)
}
  0x56   : > { %4907 = dma.hbm_to_vmem [thread:$0]  (!%p5233_p12), %s5920_s4, 2048, %s203_s12, [#allocation6], %s5138_s9, %s5138_s9, %s5139_s11  }
  0x57   : > { %p5931_p2 = scmp.ne.s32.totalorder %s5928_s30, 0 }
  0x58   : > { %p5932_p0 = scmp.eq.s32.totalorder (!%p5931_p2), %s5195_s22, 0 }
  0x59   : > { %225 = sbr.rel (%p5931_p2) target bundleno = 5498 (0x157a), region = 40 }
  0x60   : > { %5108 = dma.done.wait (%p5932_p0), [#allocation3], 30720   ;;  %p5933_p3 = pmov %p5932_p0 }
  0x61   : > { %p5934_p5 = pmov %p5932_p0 }
  0x62   : > { %5110 = vsyncadd (%p5933_p3), [#allocation3], 4294936576 }
  0x63   : > { %5112 = dma.done.wait (%p5934_p5), [#allocation6], 6144   ;;  %p5935_p10 = pmov %p5932_p0 }
  0x64   : > { %v5140_v0 = vmov 0.0|0.0   ;;  %vm5141_vm0 = vmmov 0   ;;  %v5142_v1 = vmov 0.0   ;;  %v272_v2 = vld [vmem:[#allocation2] sm:$0xff]  ;;  %v273_v3 = vld [vmem:[#allocation2 + $0x8] sm:$0xff]  ;;  %v274_v4 = vld [vmem:[#allocation2 + $0x10] sm:$0xff] }
  0x65   : > { %5114 = vsyncadd (%p5935_p10), [#allocation6], 4294961152  ;;  %4232 = vmatprep.subr.bf16.mxu0 %v5140_v0  ;;  %3319 = vmatprep.mubr.msk.f32.mxu0 %vm5141_vm0, %v5142_v1  ;;  %v4233_v5 = vpack.c.bf16 %v273_v3, %v272_v2  ;;  %v275_v6 = vld [vmem:[#allocation2 + $0x18] sm:$0xff]  ;;  %v276_v8 = vld [vmem:[#allocation2 + $0x20] sm:$0xff]  ;;  %p260_p12 = scmp.lt.s32.totalorder %s5195_s22, 1  ;;  %s2825_s23 = sshll.u32 %s5195_s22, 7 }
  0x66   : > { %4256 = vmatprep.subr.bf16.mxu1 %v5140_v0  ;;  %3354 = vmatprep.mubr.msk.f32.mxu1 %vm5141_vm0, %v5142_v1  ;;  %v4236_v7 = vpack.c.bf16 %v275_v6, %v274_v4  ;;  %v277_v9 = vld [vmem:[#allocation2 + $0x28] sm:$0xff]  ;;  %v367_v10 = vld [vmem:[#allocation2 + $0x80] sm:$0xff]  ;;  %v369_v12 = vld [vmem:[#allocation2 + $0x90] sm:$0xff]  ;;  %s5874_s15 = scalar_lea.hbm %s5921_s5, %s2825_s23  ;;  %p5938_p7 = scmp.ne.s32.totalorder %s5926_s28, 0 }
  0x67   : > { %4234 = vmatpush3.bf16.msra.mxu0 %v4233_v5  ;;  %v368_v11 = vld [vmem:[#allocation2 + $0x88] sm:$0xff]  ;;  %v370_v13 = vld [vmem:[#allocation2 + $0x98] sm:$0xff]  ;;  %v4239_v14 = vpack.c.bf16 %v277_v9, %v276_v8  ;;  %v278_v16 = vld [vmem:[#allocation2 + $0x30] sm:$0xff]  ;;  %s261_s30 = scalar_select %p260_p12, %s5195_s22, 1 }
  0x68   : > { %4235 = vmatprep.subr.bf16.mxu0 %v5140_v0  ;;  %v4257_v15 = vpack.c.bf16 %v368_v11, %v367_v10  ;;  %v279_v17 = vld [vmem:[#allocation2 + $0x38] sm:$0xff]  ;;  %v4260_v18 = vpack.c.bf16 %v370_v13, %v369_v12  ;;  %v371_v19 = vld [vmem:[#allocation2 + $0xa0] sm:$0xff]  ;;  %v372_v20 = vld [vmem:[#allocation2 + $0xa8] sm:$0xff]  ;;  %s5143_s22 = smov [#allocation8]  }
  0x69   : > { %v4242_v21 = vpack.c.bf16 %v279_v17, %v278_v16  ;;  %v280_v22 = vld [vmem:[#allocation2 + $0x40] sm:$0xff]  ;;  %v281_v23 = vld [vmem:[#allocation2 + $0x48] sm:$0xff]  ;;  %v4263_v24 = vpack.c.bf16 %v372_v20, %v371_v19  ;;  %v373_v25 = vld [vmem:[#allocation2 + $0xb0] sm:$0xff]  ;;  %s2790_s8 = sshll.u32 %s261_s30, 3  ;;  %s5067_s25 = sshll.u32 %s5143_s22, 4  ;;  %s5068_s25 = int_to_ptr.vmem [resolvable:$false] %s5067_s25 }
  0x6a   : > { %4258 = vmatpush3.bf16.msra.mxu1 %v4257_v15  ;;  %v374_v26 = vld [vmem:[#allocation2 + $0xb8] sm:$0xff]  ;;  %v4245_v27 = vpack.c.bf16 %v281_v23, %v280_v22  ;;  %v282_v28 = vld [vmem:[#allocation2 + $0x50] sm:$0xff]  ;;  %v375_v31 = vld [vmem:[#allocation2 + $0xc0] sm:$0xff]  ;;  %s263_s9 = scalar_lea.vmem %s5916_s0, %s2790_s8  ;;  %s257_s8 = sand.u32 1, %s5125_s19  }
  0x6b   : > { %4237 = vmatpush3.bf16.msra.mxu0 %v4236_v7  ;;  %4259 = vmatprep.subr.bf16.mxu1 %v5140_v0  ;;  %v283_v29 = vld [vmem:[#allocation2 + $0x58] sm:$0xff]  ;;  %v4266_v30 = vpack.c.bf16 %v374_v26, %v373_v25  ;;  %v376_v32 = vld [vmem:[#allocation2 + $0xc8] sm:$0xff]  ;;  %v284_v34 = vld [vmem:[#allocation2 + $0x60] sm:$0xff]  ;;  %s2789_s12 = sshll.u32 %s257_s8, 3  ;;  %s2676_s16 = scalar_lea.sflag [#allocation4], %s257_s8 }
  0x6c   : > { %4238 = vmatprep.subr.bf16.mxu0 %v5140_v0  ;;  %v4248_v33 = vpack.c.bf16 %v283_v29, %v282_v28  ;;  %v285_v35 = vld [vmem:[#allocation2 + $0x68] sm:$0xff]  ;;  %v4269_v36 = vpack.c.bf16 %v376_v32, %v375_v31  ;;  %v377_v37 = vld [vmem:[#allocation2 + $0xd0] sm:$0xff]  ;;  %v378_v38 = vld [vmem:[#allocation2 + $0xd8] sm:$0xff]  ;;  %s5069_s26 = scalar_lea.vmem %s5068_s25, 256 }
  0x6d   : > { %v4251_v39 = vpack.c.bf16 %v285_v35, %v284_v34  ;;  %v286_v40 = vld [vmem:[#allocation2 + $0x70] sm:$0xff]  ;;  %v287_v41 = vld [vmem:[#allocation2 + $0x78] sm:$0xff]  ;;  %v4272_v42 = vpack.c.bf16 %v378_v38, %v377_v37  ;;  %v379_v43 = vld [vmem:[#allocation2 + $0xe0] sm:$0xff] }
  0x6e   : > { %4261 = vmatpush3.bf16.msra.mxu1 %v4260_v18  ;;  %v380_v44 = vld [vmem:[#allocation2 + $0xe8] sm:$0xff]  ;;  %v4254_v45 = vpack.c.bf16 %v287_v41, %v286_v40  ;;  %v5355_v47 = vld [vmem:[%s263_s9] sm:$0xff]  ;;  %v381_v48 = vld [vmem:[#allocation2 + $0xf0] sm:$0xff]  ;;  %s259_s9 = scalar_lea.vmem [#allocation8], %s2789_s12 }
  0x6f   : > { %4240 = vmatpush3.bf16.msra.mxu0 %v4239_v14  ;;  %4262 = vmatprep.subr.bf16.mxu1 %v5140_v0  ;;  %v4275_v46 = vpack.c.bf16 %v380_v44, %v379_v43  ;;  %v382_v49 = vld [vmem:[#allocation2 + $0xf8] sm:$0xff]  ;;  %v463_v51 = vld [vmem:[#allocation2 + $0x100] sm:$0xff]  ;;  %v464_v52 = vld [vmem:[#allocation2 + $0x108] sm:$0xff]  ;;  %s2689_s11 = sshll.u32 %s259_s9, 4  ;;  %s5876_s11 = int_to_ptr.vmem [resolvable:$true] %s2689_s11 }
  0x70   : > { %4241 = vmatprep.subr.bf16.mxu0 %v5140_v0  ;;  %v4278_v50 = vpack.c.bf16 %v382_v49, %v381_v48  ;;  %v465_v53 = vld [vmem:[#allocation2 + $0x110] sm:$0xff]  ;;  %v4281_v54 = vpack.c.bf16 %v464_v52, %v463_v51  ;;  %v466_v55 = vld [vmem:[#allocation2 + $0x118] sm:$0xff]  ;;  %v467_v57 = vld [vmem:[#allocation2 + $0x120] sm:$0xff]  ;;  %s5063_s17 = scalar_lea.vmem %s5876_s11, 128  ;;  %p5070_p13 = scmp.lt.s32.totalorder %s5876_s11, %s5068_s25 }
  0x71   : > { %v4284_v56 = vpack.c.bf16 %v466_v55, %v465_v53  ;;  %v468_v58 = vld [vmem:[#allocation2 + $0x128] sm:$0xff]  ;;  %v469_v60 = vld [vmem:[#allocation2 + $0x130] sm:$0xff]  ;;  %v470_v61 = vld [vmem:[#allocation2 + $0x138] sm:$0xff]  ;;  %p5064_p4 = scmp.ne.s32.totalorder %s5876_s11, %s5063_s17  ;;  %p5071_p1 = scmp.lt.s32.totalorder %s5069_s26, %s5063_s17 }
  0x72   : > { %4264 = vmatpush3.bf16.msra.mxu1 %v4263_v24  ;;  %v4287_v59 = vpack.c.bf16 %v468_v58, %v467_v57  ;;  %v4290_v62 = vpack.c.bf16 %v470_v61, %v469_v60  ;;  %v471_v63 = vld [vmem:[#allocation2 + $0x140] sm:$0xff]  ;;  %v472_v2 = vld [vmem:[#allocation2 + $0x148] sm:$0xff]  ;;  %v473_v4 = vld [vmem:[#allocation2 + $0x150] sm:$0xff] }
  0x73   : > { %4243 = vmatpush3.bf16.msra.mxu0 %v4242_v21  ;;  %4265 = vmatprep.subr.bf16.mxu1 %v5140_v0  ;;  %v4293_v3 = vpack.c.bf16 %v472_v2, %v471_v63  ;;  %v474_v5 = vld [vmem:[#allocation2 + $0x158] sm:$0xff]  ;;  %v475_v7 = vld [vmem:[#allocation2 + $0x160] sm:$0xff]  ;;  %v476_v8 = vld [vmem:[#allocation2 + $0x168] sm:$0xff]  ;;  %p5065_p8 = pnand %p5064_p4, %p5938_p7  ;;  %p5072_p6 = por %p5071_p1, %p5070_p13 }
  0x74   : > { %4244 = vmatprep.subr.bf16.mxu0 %v5140_v0  ;;  %v4296_v6 = vpack.c.bf16 %v474_v5, %v473_v4  ;;  %v4299_v9 = vpack.c.bf16 %v476_v8, %v475_v7  ;;  %v2791_v10 = vld [vmem:[%s5918_s2] ss:$0 sm:$0xff]  ;;  %v477_v15 = vld [vmem:[#allocation2 + $0x170] sm:$0xff]  ;;  %v478_v16 = vld [vmem:[#allocation2 + $0x178] sm:$0xff] }
  0x75   : > { %v4302_v17 = vpack.c.bf16 %v478_v16, %v477_v15  ;;  %v574_v18 = vld [vmem:[#allocation5] sm:$0xff]  ;;  %v575_v19 = vld [vmem:[#allocation5 + $0x8] sm:$0xff]  ;;  %v576_v20 = vld [vmem:[#allocation5 + $0x10] sm:$0xff]  ;;  %p5066_p11 = pneg %p5065_p8 }
  0x76   : > { %4267 = vmatpush3.bf16.msra.mxu1 %v4266_v30  ;;  %v5376_v21 = vpack.c.bf16 %v575_v19, %v574_v18  ;;  %v577_v22 = vld [vmem:[#allocation5 + $0x18] sm:$0xff]  ;;  %v578_v24 = vld [vmem:[#allocation5 + $0x20] sm:$0xff]  ;;  %v579_v25 = vld [vmem:[#allocation5 + $0x28] sm:$0xff] }
  0x77   : > { %4246 = vmatpush3.bf16.msra.mxu0 %v4245_v27  ;;  %4268 = vmatprep.subr.bf16.mxu1 %v5140_v0  ;;  %v5379_v23 = vpack.c.bf16 %v577_v22, %v576_v20  ;;  %v5383_v26 = vpack.c.bf16 %v579_v25, %v578_v24  ;;  %v580_v27 = vld [vmem:[#allocation5 + $0x30] sm:$0xff]  ;;  %v581_v28 = vld [vmem:[#allocation5 + $0x38] sm:$0xff]  ;;  %v582_v30 = vld [vmem:[#allocation5 + $0x40] sm:$0xff]  ;;  %p5073_p9 = pnand %p5072_p6, %p5066_p11 }
  0x78   : > { %4247 = vmatprep.subr.bf16.mxu0 %v5140_v0  ;;  %v5387_v29 = vpack.c.bf16 %v581_v28, %v580_v27  ;;  %v583_v31 = vld [vmem:[#allocation5 + $0x48] sm:$0xff]  ;;  %v585_v34 = vld [vmem:[#allocation5 + $0x58] sm:$0xff]  ;;  %v586_v41 = vld [vmem:[#allocation5 + $0x60] sm:$0xff] }
  0x79   : > { %v5391_v32 = vpack.c.bf16 %v583_v31, %v582_v30  ;;  %v588_v44 = vld [vmem:[#allocation5 + $0x70] sm:$0xff]  ;;  %v735_v48 = vld [vmem:[#allocation2 + $0x180] sm:$0xff]  ;;  %v736_v49 = vld [vmem:[#allocation2 + $0x188] sm:$0xff] }
  0x7a   : > { %4270 = vmatpush3.bf16.msra.mxu1 %v4269_v36  ;;  %v2793_v36 = vld [vmem:[%s5918_s2 + $0x1] ss:$0 sm:$0xff]  ;;  %v4353_v51 = vpack.c.bf16 %v736_v49, %v735_v48  ;;  %v738_v52 = vld [vmem:[#allocation2 + $0x198] sm:$0xff]  ;;  %v740_v55 = vld [vmem:[#allocation2 + $0x1a8] sm:$0xff] }
  0x7b   : > { %4249 = vmatpush3.bf16.msra.mxu0 %v4248_v33  ;;  %4271 = vmatprep.subr.bf16.mxu1 %v5140_v0  ;;  %v584_v33 = vld [vmem:[#allocation5 + $0x50] sm:$0xff]  ;;  %v742_v58 = vld [vmem:[#allocation2 + $0x1b8] sm:$0xff]  ;;  %v743_v60 = vld [vmem:[#allocation2 + $0x1c0] sm:$0xff] }
  0x7c   : > { %4250 = vmatprep.subr.bf16.mxu0 %v5140_v0  ;;  %v5395_v35 = vpack.c.bf16 %v585_v34, %v584_v33  ;;  %v741_v57 = vld [vmem:[#allocation2 + $0x1b0] sm:$0xff]  ;;  %v744_v61 = vld [vmem:[#allocation2 + $0x1c8] sm:$0xff]  ;;  %v746_v2 = vld [vmem:[#allocation2 + $0x1d8] sm:$0xff] }
  0x7d   : > { %v745_v63 = vld [vmem:[#allocation2 + $0x1d0] sm:$0xff]  ;;  %v747_v4 = vld [vmem:[#allocation2 + $0x1e0] sm:$0xff]  ;;  %v748_v5 = vld [vmem:[#allocation2 + $0x1e8] sm:$0xff] }
  0x7e   : > { %4273 = vmatpush3.bf16.msra.mxu1 %v4272_v42  ;;  %v587_v42 = vld [vmem:[#allocation5 + $0x68] sm:$0xff]  ;;  %v749_v7 = vld [vmem:[#allocation2 + $0x1f0] sm:$0xff]  ;;  %v750_v8 = vld [vmem:[#allocation2 + $0x1f8] sm:$0xff] }
  0x7f   : > { %4252 = vmatpush3.bf16.msra.mxu0 %v4251_v39  ;;  %4274 = vmatprep.subr.bf16.mxu1 %v5140_v0  ;;  %v5405_v43 = vpack.c.bf16 %v587_v42, %v586_v41  ;;  %v831_v19 = vld [vmem:[#allocation2 + $0x200] sm:$0xff]  ;;  %v832_v20 = vld [vmem:[#allocation2 + $0x208] sm:$0xff]  ;;  %v833_v22 = vld [vmem:[#allocation2 + $0x210] sm:$0xff] }
  0x80   : > { %4253 = vmatprep.subr.bf16.mxu0 %v5140_v0  ;;  %v835_v27 = vld [vmem:[#allocation2 + $0x220] sm:$0xff]  ;;  %v836_v28 = vld [vmem:[#allocation2 + $0x228] sm:$0xff]  ;;  %v837_v30 = vld [vmem:[#allocation2 + $0x230] sm:$0xff] }
  0x81   : > { %v838_v31 = vld [vmem:[#allocation2 + $0x238] sm:$0xff]  ;;  %v839_v33 = vld [vmem:[#allocation2 + $0x240] sm:$0xff]  ;;  %v840_v34 = vld [vmem:[#allocation2 + $0x248] sm:$0xff] }
  0x82   : > { %4276 = vmatpush3.bf16.msra.mxu1 %v4275_v46  ;;  %v845_v42 = vld [vmem:[#allocation2 + $0x270] sm:$0xff] }
  0x83   : > { %4255 = vmatpush3.bf16.msra.mxu0 %v4254_v45  ;;  %4277 = vmatprep.subr.bf16.mxu1 %v5140_v0  ;;  %v589_v45 = vld [vmem:[#allocation5 + $0x78] sm:$0xff]  ;;  %v929_v48 = vld [vmem:[#allocation2 + $0x290] sm:$0xff] }
  0x84   : > { %4280 = vmatprep.subr.bf16.mxu0 %v5140_v0  ;;  %v5409_v46 = vpack.c.bf16 %v589_v45, %v588_v44  ;;  %v927_v45 = vld [vmem:[#allocation2 + $0x280] sm:$0xff] }
  0x86   : > { %3320 = vmatmul.mubr.f32.vlgmr.msra.gmra.mrb[0].mxu0 %v5355_v47  ;;  %4279 = vmatpush3.bf16.msra.mxu1 %v4278_v50  ;;  %v737_v50 = vld [vmem:[#allocation2 + $0x190] sm:$0xff] }
  0x87   : > { %3389 = vmatprep.mubr.msk.f32.mxu0 %vm5141_vm0, %v5142_v1  ;;  %4304 = vmatprep.subr.bf16.mxu1 %v5140_v0  ;;  %v4356_v53 = vpack.c.bf16 %v738_v52, %v737_v50  ;;  %v930_v50 = vld [vmem:[#allocation2 + $0x298] sm:$0xff]  ;;  %v931_v52 = vld [vmem:[#allocation2 + $0x2a0] sm:$0xff] }
  0x88   : > { %4282 = vmatpush3.bf16.msra.mxu0 %v4281_v54  ;;  %v739_v54 = vld [vmem:[#allocation2 + $0x1a0] sm:$0xff] }
  0x89   : > { %4283 = vmatprep.subr.bf16.mxu0 %v5140_v0 }
  0x8c   : > { %4285 = vmatpush3.bf16.msra.mxu0 %v4284_v56  ;;  %v4359_v56 = vpack.c.bf16 %v740_v55, %v739_v54  ;;  %v933_v55 = vld [vmem:[#allocation2 + $0x2b0] sm:$0xff] }
  0x8d   : > { %4286 = vmatprep.subr.bf16.mxu0 %v5140_v0 }
  0x90   : > { %4288 = vmatpush3.bf16.msra.mxu0 %v4287_v59  ;;  %v4362_v59 = vpack.c.bf16 %v742_v58, %v741_v57  ;;  %v935_v58 = vld [vmem:[#allocation2 + $0x2c0] sm:$0xff] }
  0x91   : > { %4289 = vmatprep.subr.bf16.mxu0 %v5140_v0 }
  0x94   : > { %4291 = vmatpush3.bf16.msra.mxu0 %v4290_v62  ;;  %v4365_v62 = vpack.c.bf16 %v744_v61, %v743_v60  ;;  %v937_v61 = vld [vmem:[#allocation2 + $0x2d0] sm:$0xff] }
  0x95   : > { %4292 = vmatprep.subr.bf16.mxu0 %v5140_v0 }
  0x98   : > { %4294 = vmatpush3.bf16.msra.mxu0 %v4293_v3  ;;  %v4368_v3 = vpack.c.bf16 %v746_v2, %v745_v63  ;;  %v939_v2 = vld [vmem:[#allocation2 + $0x2e0] sm:$0xff] }
  0x99   : > { %4295 = vmatprep.subr.bf16.mxu0 %v5140_v0 }
  0x9c   : > { %4297 = vmatpush3.bf16.msra.mxu0 %v4296_v6  ;;  %v4371_v6 = vpack.c.bf16 %v748_v5, %v747_v4  ;;  %v2797_v5 = vld [vmem:[%s5918_s2 + $0x3] ss:$0 sm:$0xff] }
  0x9d   : > { %4298 = vmatprep.subr.bf16.mxu0 %v5140_v0 }
  0xa0   : > { %4300 = vmatpush3.bf16.msra.mxu0 %v4299_v9  ;;  %v4374_v9 = vpack.c.bf16 %v750_v8, %v749_v7 }
  0xa1   : > { %4301 = vmatprep.subr.bf16.mxu0 %v5140_v0 }
  0xa4   : > { %4303 = vmatpush3.bf16.msra.mxu0 %v4302_v17 }
  0xa5   : > { %4352 = vmatprep.subr.bf16.mxu0 %v5140_v0 }
 0x159   : > { %v361_v11 = vpop.f32.mrb[0].mxu0 }
 0x15a   : > { %v362_v12 = vadd.f32 %v2791_v10, %v361_v11  ;;  %v3321_v13 = vpop.f32.mrb[1].mxu0  ;;  %v2795_v10 = vld [vmem:[%s5918_s2 + $0x2] ss:$0 sm:$0xff] }
 0x15c   : > { %v365_v14 = vmax.f32 %v362_v12, 0.0 }
 0x15e   : > { %3355 = vmatmul.mubr.f32.vlgmr.msra.gmra.mrb[0].mxu1 %v365_v14 }
 0x15f   : > { %3424 = vmatprep.mubr.msk.f32.mxu1 %vm5141_vm0, %v5142_v1  ;;  %4306 = vmatpush3.bf16.msra.mxu1 %v5376_v21 }
 0x160   : > { %4307 = vmatprep.subr.bf16.mxu1 %v5140_v0 }
 0x163   : > { %4309 = vmatpush3.bf16.msra.mxu1 %v5379_v23 }
 0x164   : > { %4310 = vmatprep.subr.bf16.mxu1 %v5140_v0 }
 0x167   : > { %4312 = vmatpush3.bf16.msra.mxu1 %v5383_v26 }
 0x168   : > { %4313 = vmatprep.subr.bf16.mxu1 %v5140_v0 }
 0x16b   : > { %4315 = vmatpush3.bf16.msra.mxu1 %v5387_v29 }
 0x16c   : > { %4316 = vmatprep.subr.bf16.mxu1 %v5140_v0 }
 0x16f   : > { %4318 = vmatpush3.bf16.msra.mxu1 %v5391_v32 }
 0x170   : > { %4319 = vmatprep.subr.bf16.mxu1 %v5140_v0 }
 0x173   : > { %4321 = vmatpush3.bf16.msra.mxu1 %v5395_v35 }
 0x174   : > { %4322 = vmatprep.subr.bf16.mxu1 %v5140_v0 }
 0x177   : > { %4324 = vmatpush3.bf16.msra.mxu1 %v5405_v43 }
 0x178   : > { %4325 = vmatprep.subr.bf16.mxu1 %v5140_v0 }
 0x17b   : > { %4327 = vmatpush3.bf16.msra.mxu1 %v5409_v46 }
 0x17c   : > { %4328 = vmatprep.subr.bf16.mxu1 %v5140_v0 }
 0x231   : > { %v457_v37 = vpop.f32.mrb[0].mxu1 }
 0x232   : > { %v458_v38 = vadd.f32 %v2793_v36, %v457_v37  ;;  %v3356_v39 = vpop.f32.mrb[1].mxu1  ;;  %v841_v36 = vld [vmem:[#allocation2 + $0x250] sm:$0xff]  ;;  %v842_v37 = vld [vmem:[#allocation2 + $0x258] sm:$0xff] }
 0x233   : > { %v843_v39 = vld [vmem:[#allocation2 + $0x260] sm:$0xff] }
 0x234   : > { %v461_v40 = vmax.f32 %v458_v38, 0.0  ;;  %v4392_v38 = vpack.c.bf16 %v842_v37, %v841_v36  ;;  %v564_v36 = vld [vmem:[#allocation7 + $0x30] sm:$0xff]  ;;  %v565_v37 = vld [vmem:[#allocation7 + $0x38] sm:$0xff] }
 0x236   : > { %3390 = vmatmul.mubr.f32.vlgmr.msra.gmra.mrb[2].mxu0 %v461_v40  ;;  %v844_v40 = vld [vmem:[#allocation2 + $0x268] sm:$0xff] }
 0x237   : > { %3494 = vmatprep.mubr.msk.f32.mxu0 %vm5141_vm0, %v5142_v1  ;;  %4354 = vmatpush3.bf16.msra.mxu0 %v4353_v51  ;;  %v4395_v41 = vpack.c.bf16 %v844_v40, %v843_v39  ;;  %v4404_v51 = vpack.c.bf16 %v930_v50, %v929_v48  ;;  %v566_v39 = vld [vmem:[#allocation7 + $0x40] sm:$0xff]  ;;  %v567_v40 = vld [vmem:[#allocation7 + $0x48] sm:$0xff]  ;;  %v573_v50 = vld [vmem:[#allocation7 + $0x78] sm:$0xff] }
 0x238   : > { %4355 = vmatprep.subr.bf16.mxu0 %v5140_v0 }
 0x23b   : > { %4357 = vmatpush3.bf16.msra.mxu0 %v4356_v53  ;;  %v932_v53 = vld [vmem:[#allocation2 + $0x2a8] sm:$0xff] }
 0x23c   : > { %4358 = vmatprep.subr.bf16.mxu0 %v5140_v0  ;;  %v4407_v54 = vpack.c.bf16 %v932_v53, %v931_v52 }
 0x23f   : > { %4360 = vmatpush3.bf16.msra.mxu0 %v4359_v56  ;;  %v934_v56 = vld [vmem:[#allocation2 + $0x2b8] sm:$0xff] }
 0x240   : > { %4361 = vmatprep.subr.bf16.mxu0 %v5140_v0  ;;  %v4410_v57 = vpack.c.bf16 %v934_v56, %v933_v55 }
 0x243   : > { %4363 = vmatpush3.bf16.msra.mxu0 %v4362_v59  ;;  %v936_v59 = vld [vmem:[#allocation2 + $0x2c8] sm:$0xff] }
 0x244   : > { %4364 = vmatprep.subr.bf16.mxu0 %v5140_v0  ;;  %v4413_v60 = vpack.c.bf16 %v936_v59, %v935_v58  ;;  %v1178_v59 = vld [vmem:[#allocation2 + $0x300] sm:$0xff] }
 0x247   : > { %4366 = vmatpush3.bf16.msra.mxu0 %v4365_v62  ;;  %v938_v62 = vld [vmem:[#allocation2 + $0x2d8] sm:$0xff] }
 0x248   : > { %4367 = vmatprep.subr.bf16.mxu0 %v5140_v0  ;;  %v4416_v63 = vpack.c.bf16 %v938_v62, %v937_v61 }
 0x24b   : > { %4369 = vmatpush3.bf16.msra.mxu0 %v4368_v3  ;;  %v940_v3 = vld [vmem:[#allocation2 + $0x2e8] sm:$0xff] }
 0x24c   : > { %4370 = vmatprep.subr.bf16.mxu0 %v5140_v0  ;;  %v4419_v4 = vpack.c.bf16 %v940_v3, %v939_v2  ;;  %v1180_v2 = vld [vmem:[#allocation2 + $0x310] sm:$0xff]  ;;  %v1181_v3 = vld [vmem:[#allocation2 + $0x318] sm:$0xff] }
 0x24f   : > { %4372 = vmatpush3.bf16.msra.mxu0 %v4371_v6 }
 0x250   : > { %4373 = vmatprep.subr.bf16.mxu0 %v5140_v0 }
 0x253   : > { %4375 = vmatpush3.bf16.msra.mxu0 %v4374_v9 }
 0x254   : > { %4376 = vmatprep.subr.bf16.mxu0 %v5140_v0 }
 0x309   : > { %v553_v11 = vpop.f32.mrb[2].mxu0 }
 0x30a   : > { %v554_v12 = vadd.f32 %v2795_v10, %v553_v11  ;;  %v3391_v13 = vpop.f32.mrb[3].mxu0  ;;  %v941_v10 = vld [vmem:[#allocation2 + $0x2f0] sm:$0xff]  ;;  %v942_v11 = vld [vmem:[#allocation2 + $0x2f8] sm:$0xff] }
 0x30b   : > { %v2800_v13 = vld [vmem:[%s5918_s2 + $0x4] ss:$0 sm:$0xff] }
 0x30c   : > { %v557_v14 = vadd.f32 %v554_v12, %v5355_v47  ;;  %v264_v47 = vlaneseq  ;;  %v4422_v12 = vpack.c.bf16 %v942_v11, %v941_v10  ;;  %v1186_v10 = vld [vmem:[#allocation2 + $0x340] sm:$0xff]  ;;  %v1187_v11 = vld [vmem:[#allocation2 + $0x348] sm:$0xff] }
 0x30e   : > { %v590_v15 = vpack.c.bf16 %v557_v14, %v557_v14  ;;  %v5445_v18 = vand.u32 127, %v264_v47  ;;  %v558_v47 = vld [vmem:[#allocation7] sm:$0xff] }
 0x310   : > { %v591_v16 = vunpack.c.l.bf16 %v590_v15  ;;  %vm266_vm1 = vcmp.lt.s32.totalorder %v5445_v18, 8  ;;  %vm267_vm2 = vcmp.ge.s32.totalorder %v5445_v18, 8  ;;  %vm268_vm3 = vcmp.lt.s32.totalorder %v5445_v18, 15 }
 0x311   : > { %vm5507_vm4 = vmand %vm267_vm2, %vm268_vm3  ;;  %vm270_vm5 = vcmp.eq.s32.totalorder %v5445_v18, 15 }
 0x312   : > { %v592_v17 = vsub.f32 %v557_v14, %v591_v16 }
 0x314   : > { %3425 = vmatmul.mubr.f32.vlgmr.msra.gmra.mrb[2].mxu1 %v592_v17 }
 0x315   : > { %4330 = vmatpush3.bf16.msra.mxu1 %v5376_v21  ;;  %3459 = vmatprep.mubr.msk.f32.mxu1 %vm5141_vm0, %v5142_v1  ;;  %v4377_v21 = vpack.c.bf16 %v832_v20, %v831_v19  ;;  %v559_v19 = vld [vmem:[#allocation7 + $0x8] sm:$0xff]  ;;  %v560_v20 = vld [vmem:[#allocation7 + $0x10] sm:$0xff] }
 0x316   : > { %4331 = vmatprep.subr.bf16.mxu1 %v5140_v0 }
 0x319   : > { %4333 = vmatpush3.bf16.msra.mxu1 %v5379_v23  ;;  %v834_v23 = vld [vmem:[#allocation2 + $0x218] sm:$0xff] }
 0x31a   : > { %4334 = vmatprep.subr.bf16.mxu1 %v5140_v0 }
 0x31d   : > { %4336 = vmatpush3.bf16.msra.mxu1 %v5383_v26  ;;  %v4380_v26 = vpack.c.bf16 %v834_v23, %v833_v22  ;;  %v561_v22 = vld [vmem:[#allocation7 + $0x18] sm:$0xff] }
 0x31e   : > { %4337 = vmatprep.subr.bf16.mxu1 %v5140_v0  ;;  %v5485_v23 = vpack.c.bf16 %v561_v22, %v560_v20  ;;  %v1193_v20 = vld [vmem:[#allocation2 + $0x378] sm:$0xff] }
 0x321   : > { %4339 = vmatpush3.bf16.msra.mxu1 %v5387_v29  ;;  %v4383_v29 = vpack.c.bf16 %v836_v28, %v835_v27  ;;  %v2802_v28 = vld [vmem:[%s5918_s2 + $0x5] ss:$0 sm:$0xff] }
 0x322   : > { %4340 = vmatprep.subr.bf16.mxu1 %v5140_v0 }
 0x325   : > { %4342 = vmatpush3.bf16.msra.mxu1 %v5391_v32  ;;  %v4386_v32 = vpack.c.bf16 %v838_v31, %v837_v30 }
 0x326   : > { %4343 = vmatprep.subr.bf16.mxu1 %v5140_v0 }
 0x329   : > { %4345 = vmatpush3.bf16.msra.mxu1 %v5395_v35  ;;  %v4389_v35 = vpack.c.bf16 %v840_v34, %v839_v33 }
 0x32a   : > { %4346 = vmatprep.subr.bf16.mxu1 %v5140_v0 }
 0x32d   : > { %4348 = vmatpush3.bf16.msra.mxu1 %v5405_v43  ;;  %v846_v43 = vld [vmem:[#allocation2 + $0x278] sm:$0xff] }
 0x32e   : > { %4349 = vmatprep.subr.bf16.mxu1 %v5140_v0  ;;  %v4398_v44 = vpack.c.bf16 %v846_v43, %v845_v42  ;;  %v568_v42 = vld [vmem:[#allocation7 + $0x50] sm:$0xff]  ;;  %v569_v43 = vld [vmem:[#allocation7 + $0x58] sm:$0xff] }
 0x331   : > { %4351 = vmatpush3.bf16.msra.mxu1 %v5409_v46  ;;  %v928_v46 = vld [vmem:[#allocation2 + $0x288] sm:$0xff] }
 0x332   : > { %4400 = vmatprep.subr.bf16.mxu1 %v5140_v0  ;;  %v4401_v49 = vpack.c.bf16 %v928_v46, %v927_v45  ;;  %v570_v45 = vld [vmem:[#allocation7 + $0x60] sm:$0xff]  ;;  %v571_v46 = vld [vmem:[#allocation7 + $0x68] sm:$0xff] }
 0x333   : > { %v5529_v48 = vpack.c.bf16 %v571_v46, %v570_v45  ;;  %v1284_v46 = vld [vmem:[#allocation2 + $0x3d0] sm:$0xff] }
 0x334   : > { %3460 = vmatmul.mubr.f32.vlgmr.msra.gmra.mrb[2].mxu1 %v591_v16 }
 0x335   : > { %3564 = vmatprep.mubr.msk.f32.mxu1 %vm5141_vm0, %v5142_v1  ;;  %4402 = vmatpush3.bf16.msra.mxu1 %v4401_v49  ;;  %v572_v49 = vld [vmem:[#allocation7 + $0x70] sm:$0xff] }
 0x336   : > { %4403 = vmatprep.subr.bf16.mxu1 %v5140_v0 }
 0x339   : > { %4405 = vmatpush3.bf16.msra.mxu1 %v4404_v51  ;;  %v5535_v51 = vpack.c.bf16 %v573_v50, %v572_v49  ;;  %v1285_v49 = vld [vmem:[#allocation2 + $0x3d8] sm:$0xff] }
 0x33a   : > { %4406 = vmatprep.subr.bf16.mxu1 %v5140_v0  ;;  %v4512_v50 = vpack.c.bf16 %v1285_v49, %v1284_v46 }
 0x33d   : > { %4408 = vmatpush3.bf16.msra.mxu1 %v4407_v54 }
 0x33e   : > { %4409 = vmatprep.subr.bf16.mxu1 %v5140_v0 }
 0x341   : > { %4411 = vmatpush3.bf16.msra.mxu1 %v4410_v57 }
 0x342   : > { %4412 = vmatprep.subr.bf16.mxu1 %v5140_v0 }
 0x345   : > { %4414 = vmatpush3.bf16.msra.mxu1 %v4413_v60  ;;  %v1179_v60 = vld [vmem:[#allocation2 + $0x308] sm:$0xff] }
 0x346   : > { %4415 = vmatprep.subr.bf16.mxu1 %v5140_v0  ;;  %v4473_v62 = vpack.c.bf16 %v1179_v60, %v1178_v59 }
 0x349   : > { %4417 = vmatpush3.bf16.msra.mxu1 %v4416_v63 }
 0x34a   : > { %4418 = vmatprep.subr.bf16.mxu1 %v5140_v0 }
 0x34d   : > { %4420 = vmatpush3.bf16.msra.mxu1 %v4419_v4  ;;  %v4476_v4 = vpack.c.bf16 %v1181_v3, %v1180_v2  ;;  %v1370_v3 = vld [vmem:[#allocation2 + $0x400] sm:$0xff] }
 0x34e   : > { %4421 = vmatprep.subr.bf16.mxu1 %v5140_v0 }
 0x351   : > { %4423 = vmatpush3.bf16.msra.mxu1 %v4422_v12  ;;  %v4485_v12 = vpack.c.bf16 %v1187_v11, %v1186_v10  ;;  %v1376_v10 = vld [vmem:[#allocation2 + $0x430] sm:$0xff]  ;;  %v1377_v11 = vld [vmem:[#allocation2 + $0x438] sm:$0xff] }
 0x352   : > { %4448 = vmatprep.subr.bf16.mxu1 %v5140_v0 }
 0x407   : > { %v5448_v24 = vpop.f32.mrb[2].mxu1 }
 0x408   : > { %v3461_v25 = vpop.f32.mrb[3].mxu1  ;;  %3495 = vmatmul.mubr.msk.f32.vlgmr.msra.gmra.mrb[4].mxu0 %vm266_vm1, %v5448_v24 }
 0x409   : > { %4378 = vmatpush3.bf16.msra.mxu0 %v4377_v21  ;;  %3529 = vmatprep.mubr.msk.f32.mxu0 %vm5141_vm0, %v5142_v1  ;;  %v5481_v21 = vpack.c.bf16 %v559_v19, %v558_v47  ;;  %v562_v25 = vld [vmem:[#allocation7 + $0x20] sm:$0xff]  ;;  %v1192_v19 = vld [vmem:[#allocation2 + $0x370] sm:$0xff] }
 0x40a   : > { %4379 = vmatprep.subr.bf16.mxu0 %v5140_v0  ;;  %v4494_v22 = vpack.c.bf16 %v1193_v20, %v1192_v19  ;;  %v1382_v19 = vld [vmem:[#allocation2 + $0x460] sm:$0xff]  ;;  %v1383_v20 = vld [vmem:[#allocation2 + $0x468] sm:$0xff] }
 0x40d   : > { %4381 = vmatpush3.bf16.msra.mxu0 %v4380_v26  ;;  %v563_v26 = vld [vmem:[#allocation7 + $0x28] sm:$0xff] }
 0x40e   : > { %4382 = vmatprep.subr.bf16.mxu0 %v5140_v0  ;;  %v5491_v27 = vpack.c.bf16 %v563_v26, %v562_v25  ;;  %v1274_v25 = vld [vmem:[#allocation2 + $0x380] sm:$0xff]  ;;  %v1275_v26 = vld [vmem:[#allocation2 + $0x388] sm:$0xff] }
 0x411   : > { %4384 = vmatpush3.bf16.msra.mxu0 %v4383_v29 }
 0x412   : > { %4385 = vmatprep.subr.bf16.mxu0 %v5140_v0 }
 0x415   : > { %4387 = vmatpush3.bf16.msra.mxu0 %v4386_v32 }
 0x416   : > { %4388 = vmatprep.subr.bf16.mxu0 %v5140_v0 }
 0x419   : > { %4390 = vmatpush3.bf16.msra.mxu0 %v4389_v35 }
 0x41a   : > { %4391 = vmatprep.subr.bf16.mxu0 %v5140_v0 }
 0x41d   : > { %4393 = vmatpush3.bf16.msra.mxu0 %v4392_v38  ;;  %v5513_v38 = vpack.c.bf16 %v565_v37, %v564_v36  ;;  %v1280_v37 = vld [vmem:[#allocation2 + $0x3b0] sm:$0xff] }
 0x41e   : > { %4394 = vmatprep.subr.bf16.mxu0 %v5140_v0 }
 0x421   : > { %4396 = vmatpush3.bf16.msra.mxu0 %v4395_v41  ;;  %v5519_v41 = vpack.c.bf16 %v567_v40, %v566_v39  ;;  %v1281_v39 = vld [vmem:[#allocation2 + $0x3b8] sm:$0xff] }
 0x422   : > { %4397 = vmatprep.subr.bf16.mxu0 %v5140_v0  ;;  %v4506_v40 = vpack.c.bf16 %v1281_v39, %v1280_v37 }
 0x425   : > { %4399 = vmatpush3.bf16.msra.mxu0 %v4398_v44  ;;  %v5523_v44 = vpack.c.bf16 %v569_v43, %v568_v42  ;;  %v1282_v42 = vld [vmem:[#allocation2 + $0x3c0] sm:$0xff]  ;;  %v1283_v43 = vld [vmem:[#allocation2 + $0x3c8] sm:$0xff] }
 0x426   : > { %4424 = vmatprep.subr.bf16.mxu0 %v5140_v0  ;;  %v4509_v45 = vpack.c.bf16 %v1283_v43, %v1282_v42  ;;  %v2809_v43 = vld [vmem:[%s5918_s2 + $0x8] ss:$0 sm:$0xff] }
 0x4db   : > { %v825_v6 = vpop.f32.mrb[4].mxu0 }
 0x4dc   : > { %v826_v7 = vadd.f32 %v2797_v5, %v825_v6  ;;  %v3496_v8 = vpop.f32.mrb[5].mxu0  ;;  %v1183_v5 = vld [vmem:[#allocation2 + $0x328] sm:$0xff] }
 0x4dd   : > { %v1185_v8 = vld [vmem:[#allocation2 + $0x338] sm:$0xff] }
 0x4de   : > { %v829_v9 = vmax.f32 %v826_v7, 0.0  ;;  %v1184_v7 = vld [vmem:[#allocation2 + $0x330] sm:$0xff] }
 0x4e0   : > { %3530 = vmatmul.mubr.f32.vlgmr.msra.gmra.mrb[6].mxu0 %v829_v9  ;;  %v4482_v9 = vpack.c.bf16 %v1185_v8, %v1184_v7  ;;  %v1374_v7 = vld [vmem:[#allocation2 + $0x420] sm:$0xff]  ;;  %v1375_v8 = vld [vmem:[#allocation2 + $0x428] sm:$0xff] }
 0x4e1   : > { %3599 = vmatprep.mubr.msk.f32.mxu0 %vm5141_vm0, %v5142_v1  ;;  %4426 = vmatpush3.bf16.msra.mxu0 %v5481_v21 }
 0x4e2   : > { %4427 = vmatprep.subr.bf16.mxu0 %v5140_v0 }
 0x4e5   : > { %4429 = vmatpush3.bf16.msra.mxu0 %v5485_v23 }
 0x4e6   : > { %4430 = vmatprep.subr.bf16.mxu0 %v5140_v0 }
 0x4e9   : > { %4432 = vmatpush3.bf16.msra.mxu0 %v5491_v27 }
 0x4ea   : > { %4433 = vmatprep.subr.bf16.mxu0 %v5140_v0 }
 0x4ed   : > { %4435 = vmatpush3.bf16.msra.mxu0 %v5513_v38 }
 0x4ee   : > { %4436 = vmatprep.subr.bf16.mxu0 %v5140_v0 }
 0x4f1   : > { %4438 = vmatpush3.bf16.msra.mxu0 %v5519_v41 }
 0x4f2   : > { %4439 = vmatprep.subr.bf16.mxu0 %v5140_v0 }
 0x4f5   : > { %4441 = vmatpush3.bf16.msra.mxu0 %v5523_v44 }
 0x4f6   : > { %4442 = vmatprep.subr.bf16.mxu0 %v5140_v0 }
 0x4f9   : > { %4444 = vmatpush3.bf16.msra.mxu0 %v5529_v48 }
 0x4fa   : > { %4445 = vmatprep.subr.bf16.mxu0 %v5140_v0 }
 0x4fd   : > { %4447 = vmatpush3.bf16.msra.mxu0 %v5535_v51 }
 0x4fe   : > { %4472 = vmatprep.subr.bf16.mxu0 %v5140_v0 }
 0x5b3   : > { %v921_v14 = vpop.f32.mrb[6].mxu0 }
 0x5b4   : > { %v922_v15 = vadd.f32 %v2800_v13, %v921_v14  ;;  %v3531_v16 = vpop.f32.mrb[7].mxu0  ;;  %v1188_v13 = vld [vmem:[#allocation2 + $0x350] sm:$0xff]  ;;  %v1189_v14 = vld [vmem:[#allocation2 + $0x358] sm:$0xff] }
 0x5b5   : > { %v1190_v16 = vld [vmem:[#allocation2 + $0x360] sm:$0xff] }
 0x5b6   : > { %v925_v17 = vmax.f32 %v922_v15, 0.0  ;;  %v4488_v15 = vpack.c.bf16 %v1189_v14, %v1188_v13  ;;  %v1378_v13 = vld [vmem:[#allocation2 + $0x440] sm:$0xff]  ;;  %v1379_v14 = vld [vmem:[#allocation2 + $0x448] sm:$0xff] }
 0x5b8   : > { %3565 = vmatmul.mubr.f32.vlgmr.msra.gmra.mrb[4].mxu1 %v925_v17  ;;  %v1191_v17 = vld [vmem:[#allocation2 + $0x368] sm:$0xff] }
 0x5b9   : > { %3634 = vmatprep.mubr.msk.f32.mxu1 %vm5141_vm0, %v5142_v1  ;;  %4450 = vmatpush3.bf16.msra.mxu1 %v5481_v21  ;;  %v4491_v47 = vpack.c.bf16 %v1191_v17, %v1190_v16  ;;  %v1380_v16 = vld [vmem:[#allocation2 + $0x450] sm:$0xff]  ;;  %v1381_v17 = vld [vmem:[#allocation2 + $0x458] sm:$0xff] }
 0x5ba   : > { %4451 = vmatprep.subr.bf16.mxu1 %v5140_v0 }
 0x5bd   : > { %4453 = vmatpush3.bf16.msra.mxu1 %v5485_v23 }
 0x5be   : > { %4454 = vmatprep.subr.bf16.mxu1 %v5140_v0 }
 0x5c1   : > { %4456 = vmatpush3.bf16.msra.mxu1 %v5491_v27 }
 0x5c2   : > { %4457 = vmatprep.subr.bf16.mxu1 %v5140_v0 }
 0x5c5   : > { %4459 = vmatpush3.bf16.msra.mxu1 %v5513_v38 }
 0x5c6   : > { %4460 = vmatprep.subr.bf16.mxu1 %v5140_v0 }
 0x5c9   : > { %4462 = vmatpush3.bf16.msra.mxu1 %v5519_v41 }
 0x5ca   : > { %4463 = vmatprep.subr.bf16.mxu1 %v5140_v0 }
 0x5cd   : > { %4465 = vmatpush3.bf16.msra.mxu1 %v5523_v44 }
 0x5ce   : > { %4466 = vmatprep.subr.bf16.mxu1 %v5140_v0 }
 0x5d1   : > { %4468 = vmatpush3.bf16.msra.mxu1 %v5529_v48 }
 0x5d2   : > { %4469 = vmatprep.subr.bf16.mxu1 %v5140_v0 }
 0x5d5   : > { %4471 = vmatpush3.bf16.msra.mxu1 %v5535_v51 }
 0x5d6   : > { %4496 = vmatprep.subr.bf16.mxu1 %v5140_v0 }
 0x68b   : > { %v1017_v29 = vpop.f32.mrb[4].mxu1 }
 0x68c   : > { %v5502_v30 = vadd.f32 %v2802_v28, %v1017_v29  ;;  %v3566_v31 = vpop.f32.mrb[5].mxu1  ;;  %v1276_v28 = vld [vmem:[#allocation2 + $0x390] sm:$0xff]  ;;  %v4497_v29 = vpack.c.bf16 %v1275_v26, %v1274_v25  ;;  %v2804_v25 = vld [vmem:[%s5918_s2 + $0x6] ss:$0 sm:$0xff] }
 0x68d   : > { %v1277_v31 = vld [vmem:[#allocation2 + $0x398] sm:$0xff] }
 0x68e   : > { %4959 = vtanh.f32 %v5502_v30  ;;  %v1174_v60 = vsel %vm266_vm1, %v5502_v30, 0.0  ;;  %v1373_v30 = vld [vmem:[#allocation2 + $0x418] sm:$0xff] }
 0x698   : > { %v4960_v32 = vpop.eup %4959 }
 0x699   : > { %v1022_v34 = vmul.f32 0.1, %v4960_v32  ;;  %v4500_v32 = vpack.c.bf16 %v1277_v31, %v1276_v28 }
 0x69b   : > { %v1023_v35 = vsel %vm5507_vm4, %v1022_v34, 0.0  ;;  %v1278_v34 = vld [vmem:[#allocation2 + $0x3a0] sm:$0xff] }
 0x69c   : > { %1024 = vadd.xlane.f32.xlu0 %v1023_v35 }
 0x729   : > { %v1025_v52 = vpop.xlane.xlu0 %1024 }
 0x72a   : > { %v1026_v53 = vsub.f32 0.0, %v1025_v52  ;;  %v1286_v52 = vld [vmem:[#allocation2 + $0x3e0] sm:$0xff] }
 0x72c   : > { %v1027_v54 = vsel %vm270_vm5, %v1026_v53, %v1023_v35  ;;  %v1279_v35 = vld [vmem:[#allocation2 + $0x3a8] sm:$0xff] }
 0x72d   : > { %v1028_v55 = vmul.f32 1.442695, %v1027_v54  ;;  %v4503_v36 = vpack.c.bf16 %v1279_v35, %v1278_v34  ;;  %v1287_v53 = vld [vmem:[#allocation2 + $0x3e8] sm:$0xff]  ;;  %v1385_v34 = vld [vmem:[#allocation2 + $0x478] sm:$0xff] }
 0x72e   : > { %v4515_v54 = vpack.c.bf16 %v1287_v53, %v1286_v52 }
 0x72f   : > { %4961 = vpow2.f32 %v1028_v55 }
 0x739   : > { %v4962_v56 = vpop.eup %4961 }
 0x73a   : > { %v1030_v57 = vmul.f32 %v4962_v56, %v5448_v24  ;;  %v1182_v24 = vld [vmem:[#allocation2 + $0x320] sm:$0xff] }
 0x73b   : > { %v4479_v6 = vpack.c.bf16 %v1183_v5, %v1182_v24  ;;  %v1372_v24 = vld [vmem:[#allocation2 + $0x410] sm:$0xff] }
 0x73c   : > { %v1031_v58 = vpack.c.bf16 %v1030_v57, %v1030_v57 }
 0x73e   : > { %v1032_v61 = vunpack.c.l.bf16 %v1031_v58 }
 0x740   : > { %3635 = vmatmul.mubr.f32.vlgmr.msra.gmra.mrb[6].mxu1 %v1032_v61  ;;  %v1033_v63 = vsub.f32 %v1030_v57, %v1032_v61 }
 0x741   : > { %3704 = vmatprep.mubr.msk.f32.mxu1 %vm5141_vm0, %v5142_v1  ;;  %4498 = vmatpush3.bf16.msra.mxu1 %v4497_v29 }
 0x742   : > { %3600 = vmatmul.mubr.f32.vlgmr.msra.gmra.mrb[8].mxu0 %v1033_v63  ;;  %4499 = vmatprep.subr.bf16.mxu1 %v5140_v0  ;;  %v1289_v63 = vld [vmem:[#allocation2 + $0x3f8] sm:$0xff] }
 0x743   : > { %4474 = vmatpush3.bf16.msra.mxu0 %v4473_v62  ;;  %3669 = vmatprep.mubr.msk.f32.mxu0 %vm5141_vm0, %v5142_v1  ;;  %v1288_v62 = vld [vmem:[#allocation2 + $0x3f0] sm:$0xff] }
 0x744   : > { %4475 = vmatprep.subr.bf16.mxu0 %v5140_v0  ;;  %v4518_v2 = vpack.c.bf16 %v1289_v63, %v1288_v62  ;;  %v1620_v62 = vld [vmem:[#allocation5 + $0x80] sm:$0xff]  ;;  %v1621_v63 = vld [vmem:[#allocation5 + $0x88] sm:$0xff] }
 0x745   : > { %4501 = vmatpush3.bf16.msra.mxu1 %v4500_v32  ;;  %v1384_v32 = vld [vmem:[#allocation2 + $0x470] sm:$0xff] }
 0x746   : > { %4502 = vmatprep.subr.bf16.mxu1 %v5140_v0  ;;  %v4542_v35 = vpack.c.bf16 %v1385_v34, %v1384_v32  ;;  %v1784_v32 = vld [vmem:[#allocation2 + $0x498] sm:$0xff] }
 0x747   : > { %4477 = vmatpush3.bf16.msra.mxu0 %v4476_v4  ;;  %v1371_v4 = vld [vmem:[#allocation2 + $0x408] sm:$0xff] }
 0x748   : > { %4478 = vmatprep.subr.bf16.mxu0 %v5140_v0  ;;  %v4521_v5 = vpack.c.bf16 %v1371_v4, %v1370_v3  ;;  %v5638_v3 = vpack.c.bf16 %v1621_v63, %v1620_v62 }
 0x749   : > { %4504 = vmatpush3.bf16.msra.mxu1 %v4503_v36  ;;  %v2807_v36 = vld [vmem:[%s5918_s2 + $0x7] ss:$0 sm:$0xff] }
 0x74a   : > { %4505 = vmatprep.subr.bf16.mxu1 %v5140_v0 }
 0x74b   : > { %4480 = vmatpush3.bf16.msra.mxu0 %v4479_v6  ;;  %v4524_v6 = vpack.c.bf16 %v1373_v30, %v1372_v24  ;;  %v1622_v24 = vld [vmem:[#allocation5 + $0x90] sm:$0xff] }
 0x74c   : > { %4481 = vmatprep.subr.bf16.mxu0 %v5140_v0 }
 0x74d   : > { %4507 = vmatpush3.bf16.msra.mxu1 %v4506_v40 }
 0x74e   : > { %4508 = vmatprep.subr.bf16.mxu1 %v5140_v0 }
 0x74f   : > { %4483 = vmatpush3.bf16.msra.mxu0 %v4482_v9  ;;  %v4527_v9 = vpack.c.bf16 %v1375_v8, %v1374_v7  ;;  %v1626_v8 = vld [vmem:[#allocation5 + $0xb0] sm:$0xff] }
 0x750   : > { %4484 = vmatprep.subr.bf16.mxu0 %v5140_v0 }
 0x751   : > { %4510 = vmatpush3.bf16.msra.mxu1 %v4509_v45 }
 0x752   : > { %4511 = vmatprep.subr.bf16.mxu1 %v5140_v0 }
 0x753   : > { %4486 = vmatpush3.bf16.msra.mxu0 %v4485_v12  ;;  %v4530_v12 = vpack.c.bf16 %v1377_v11, %v1376_v10  ;;  %v1628_v11 = vld [vmem:[#allocation5 + $0xc0] sm:$0xff] }
 0x754   : > { %4487 = vmatprep.subr.bf16.mxu0 %v5140_v0 }
 0x755   : > { %4513 = vmatpush3.bf16.msra.mxu1 %v4512_v50 }
 0x756   : > { %4514 = vmatprep.subr.bf16.mxu1 %v5140_v0 }
 0x757   : > { %4489 = vmatpush3.bf16.msra.mxu0 %v4488_v15  ;;  %v4533_v15 = vpack.c.bf16 %v1379_v14, %v1378_v13  ;;  %v1630_v14 = vld [vmem:[#allocation5 + $0xd0] sm:$0xff] }
 0x758   : > { %4490 = vmatprep.subr.bf16.mxu0 %v5140_v0 }
 0x759   : > { %4516 = vmatpush3.bf16.msra.mxu1 %v4515_v54 }
 0x75a   : > { %4517 = vmatprep.subr.bf16.mxu1 %v5140_v0 }
 0x75b   : > { %4492 = vmatpush3.bf16.msra.mxu0 %v4491_v47  ;;  %v4536_v47 = vpack.c.bf16 %v1381_v17, %v1380_v16  ;;  %v1632_v17 = vld [vmem:[#allocation5 + $0xe0] sm:$0xff] }
 0x75c   : > { %4493 = vmatprep.subr.bf16.mxu0 %v5140_v0 }
 0x75d   : > { %4519 = vmatpush3.bf16.msra.mxu1 %v4518_v2 }
 0x75e   : > { %4544 = vmatprep.subr.bf16.mxu1 %v5140_v0 }
 0x75f   : > { %4495 = vmatpush3.bf16.msra.mxu0 %v4494_v22  ;;  %v4539_v22 = vpack.c.bf16 %v1383_v20, %v1382_v19  ;;  %v1634_v20 = vld [vmem:[#allocation5 + $0xf0] sm:$0xff] }
 0x760   : > { %4520 = vmatprep.subr.bf16.mxu0 %v5140_v0 }
 0x813   : > { %v1170_v55 = vpop.f32.mrb[6].mxu1 }
 0x814   : > { %v3636_v56 = vpop.f32.mrb[7].mxu1 }
 0x815   : > { %v1100_v57 = vpop.f32.mrb[8].mxu0 }
 0x816   : > { %v1171_v58 = vadd.f32 %v1170_v55, %v1100_v57  ;;  %v3601_v59 = vpop.f32.mrb[9].mxu0 }
 0x818   : > { %v5569_v61 = vadd.f32 %v1174_v60, %v1171_v58 }
 0x81a   : > { %3670 = vmatmul.mubr.msk.f32.vlgmr.msra.gmra.mrb[10].mxu0 %vm266_vm1, %v5569_v61 }
 0x81b   : > { %3739 = vmatprep.mubr.msk.f32.mxu0 %vm5141_vm0, %v5142_v1  ;;  %4522 = vmatpush3.bf16.msra.mxu0 %v4521_v5  ;;  %v1623_v5 = vld [vmem:[#allocation5 + $0x98] sm:$0xff] }
 0x81c   : > { %4523 = vmatprep.subr.bf16.mxu0 %v5140_v0  ;;  %v5643_v30 = vpack.c.bf16 %v1623_v5, %v1622_v24 }
 0x81f   : > { %4525 = vmatpush3.bf16.msra.mxu0 %v4524_v6  ;;  %v1625_v6 = vld [vmem:[#allocation5 + $0xa8] sm:$0xff] }
 0x820   : > { %4526 = vmatprep.subr.bf16.mxu0 %v5140_v0 }
 0x823   : > { %4528 = vmatpush3.bf16.msra.mxu0 %v4527_v9  ;;  %v1627_v9 = vld [vmem:[#allocation5 + $0xb8] sm:$0xff] }
 0x824   : > { %4529 = vmatprep.subr.bf16.mxu0 %v5140_v0  ;;  %v5653_v10 = vpack.c.bf16 %v1627_v9, %v1626_v8  ;;  %v1880_v9 = vld [vmem:[#allocation2 + $0x518] sm:$0xff] }
 0x827   : > { %4531 = vmatpush3.bf16.msra.mxu0 %v4530_v12  ;;  %v1629_v12 = vld [vmem:[#allocation5 + $0xc8] sm:$0xff] }
 0x828   : > { %4532 = vmatprep.subr.bf16.mxu0 %v5140_v0  ;;  %v5657_v13 = vpack.c.bf16 %v1629_v12, %v1628_v11 }
 0x82b   : > { %4534 = vmatpush3.bf16.msra.mxu0 %v4533_v15  ;;  %v1631_v15 = vld [vmem:[#allocation5 + $0xd8] sm:$0xff] }
 0x82c   : > { %4535 = vmatprep.subr.bf16.mxu0 %v5140_v0  ;;  %v5662_v16 = vpack.c.bf16 %v1631_v15, %v1630_v14  ;;  %v1882_v14 = vld [vmem:[#allocation2 + $0x528] sm:$0xff] }
 0x82f   : > { %4537 = vmatpush3.bf16.msra.mxu0 %v4536_v47  ;;  %v1633_v47 = vld [vmem:[#allocation5 + $0xe8] sm:$0xff] }
 0x830   : > { %4538 = vmatprep.subr.bf16.mxu0 %v5140_v0  ;;  %v5666_v19 = vpack.c.bf16 %v1633_v47, %v1632_v17  ;;  %v1884_v17 = vld [vmem:[#allocation2 + $0x538] sm:$0xff] }
 0x833   : > { %4540 = vmatpush3.bf16.msra.mxu0 %v4539_v22  ;;  %v1635_v22 = vld [vmem:[#allocation5 + $0xf8] sm:$0xff] }
 0x834   : > { %4541 = vmatprep.subr.bf16.mxu0 %v5140_v0 }
 0x837   : > { %4543 = vmatpush3.bf16.msra.mxu0 %v4542_v35  ;;  %v1785_v35 = vld [vmem:[#allocation2 + $0x4a0] sm:$0xff] }
 0x838   : > { %4568 = vmatprep.subr.bf16.mxu0 %v5140_v0 }
 0x8ed   : > { %v1268_v26 = vpop.f32.mrb[10].mxu0 }
 0x8ee   : > { %v1269_v28 = vadd.f32 %v2804_v25, %v1268_v26  ;;  %v3671_v29 = vpop.f32.mrb[11].mxu0  ;;  %v5670_v25 = vpack.c.bf16 %v1635_v22, %v1634_v20  ;;  %v1781_v26 = vld [vmem:[#allocation2 + $0x480] sm:$0xff]  ;;  %v1886_v20 = vld [vmem:[#allocation2 + $0x548] sm:$0xff] }
 0x8ef   : > { %v1783_v29 = vld [vmem:[#allocation2 + $0x490] sm:$0xff] }
 0x8f0   : > { %v1272_v31 = vmax.f32 %v1269_v28, 0.0  ;;  %v1782_v28 = vld [vmem:[#allocation2 + $0x488] sm:$0xff]  ;;  %v4644_v34 = vpack.c.bf16 %v1784_v32, %v1783_v29  ;;  %v1889_v29 = vld [vmem:[#allocation2 + $0x560] sm:$0xff] }
 0x8f2   : > { %3705 = vmatmul.mubr.f32.vlgmr.msra.gmra.mrb[8].mxu1 %v1272_v31  ;;  %v4641_v31 = vpack.c.bf16 %v1782_v28, %v1781_v26  ;;  %v1888_v26 = vld [vmem:[#allocation2 + $0x558] sm:$0xff] }
 0x8f3   : > { %4546 = vmatpush3.bf16.msra.mxu1 %v5481_v21  ;;  %3774 = vmatprep.mubr.msk.f32.mxu1 %vm5141_vm0, %v5142_v1 }
 0x8f4   : > { %4547 = vmatprep.subr.bf16.mxu1 %v5140_v0 }
 0x8f7   : > { %4549 = vmatpush3.bf16.msra.mxu1 %v5485_v23 }
 0x8f8   : > { %4550 = vmatprep.subr.bf16.mxu1 %v5140_v0 }
 0x8fb   : > { %4552 = vmatpush3.bf16.msra.mxu1 %v5491_v27 }
 0x8fc   : > { %4553 = vmatprep.subr.bf16.mxu1 %v5140_v0 }
 0x8ff   : > { %4555 = vmatpush3.bf16.msra.mxu1 %v5513_v38 }
 0x900   : > { %4556 = vmatprep.subr.bf16.mxu1 %v5140_v0 }
 0x903   : > { %4558 = vmatpush3.bf16.msra.mxu1 %v5519_v41 }
 0x904   : > { %4559 = vmatprep.subr.bf16.mxu1 %v5140_v0 }
 0x907   : > { %4561 = vmatpush3.bf16.msra.mxu1 %v5523_v44 }
 0x908   : > { %4562 = vmatprep.subr.bf16.mxu1 %v5140_v0 }
 0x90b   : > { %4564 = vmatpush3.bf16.msra.mxu1 %v5529_v48 }
 0x90c   : > { %4565 = vmatprep.subr.bf16.mxu1 %v5140_v0 }
 0x90f   : > { %4567 = vmatpush3.bf16.msra.mxu1 %v5535_v51 }
 0x910   : > { %4592 = vmatprep.subr.bf16.mxu1 %v5140_v0 }
 0x9c5   : > { %v1364_v37 = vpop.f32.mrb[8].mxu1 }
 0x9c6   : > { %v1365_v39 = vadd.f32 %v2807_v36, %v1364_v37  ;;  %v3706_v40 = vpop.f32.mrb[9].mxu1  ;;  %v1786_v36 = vld [vmem:[#allocation2 + $0x4a8] sm:$0xff] }
 0x9c7   : > { %v4647_v37 = vpack.c.bf16 %v1786_v36, %v1785_v35  ;;  %v1788_v40 = vld [vmem:[#allocation2 + $0x4b8] sm:$0xff] }
 0x9c8   : > { %v1368_v42 = vmax.f32 %v1365_v39, 0.0  ;;  %v1787_v39 = vld [vmem:[#allocation2 + $0x4b0] sm:$0xff]  ;;  %v1892_v35 = vld [vmem:[#allocation2 + $0x578] sm:$0xff] }
 0x9ca   : > { %3740 = vmatmul.mubr.f32.vlgmr.msra.gmra.mrb[12].mxu0 %v1368_v42  ;;  %v4650_v42 = vpack.c.bf16 %v1788_v40, %v1787_v39  ;;  %v1974_v39 = vld [vmem:[#allocation2 + $0x588] sm:$0xff]  ;;  %v1975_v40 = vld [vmem:[#allocation2 + $0x590] sm:$0xff] }
 0x9cb   : > { %4570 = vmatpush3.bf16.msra.mxu0 %v5481_v21  ;;  %3809 = vmatprep.mubr.msk.f32.mxu0 %vm5141_vm0, %v5142_v1 }
 0x9cc   : > { %4571 = vmatprep.subr.bf16.mxu0 %v5140_v0 }
 0x9cf   : > { %4573 = vmatpush3.bf16.msra.mxu0 %v5485_v23 }
 0x9d0   : > { %4574 = vmatprep.subr.bf16.mxu0 %v5140_v0 }
 0x9d3   : > { %4576 = vmatpush3.bf16.msra.mxu0 %v5491_v27 }
 0x9d4   : > { %4577 = vmatprep.subr.bf16.mxu0 %v5140_v0 }
 0x9d7   : > { %4579 = vmatpush3.bf16.msra.mxu0 %v5513_v38 }
 0x9d8   : > { %4580 = vmatprep.subr.bf16.mxu0 %v5140_v0 }
 0x9db   : > { %4582 = vmatpush3.bf16.msra.mxu0 %v5519_v41 }
 0x9dc   : > { %4583 = vmatprep.subr.bf16.mxu0 %v5140_v0 }
 0x9df   : > { %4585 = vmatpush3.bf16.msra.mxu0 %v5523_v44 }
 0x9e0   : > { %4586 = vmatprep.subr.bf16.mxu0 %v5140_v0 }
 0x9e3   : > { %4588 = vmatpush3.bf16.msra.mxu0 %v5529_v48 }
 0x9e4   : > { %4589 = vmatprep.subr.bf16.mxu0 %v5140_v0 }
 0x9e7   : > { %4591 = vmatpush3.bf16.msra.mxu0 %v5535_v51 }
 0x9e8   : > { %4640 = vmatprep.subr.bf16.mxu0 %v5140_v0 }
 0xa9d   : > { %v1460_v45 = vpop.f32.mrb[12].mxu0 }
 0xa9e   : > { %v5630_v46 = vadd.f32 %v2809_v43, %v1460_v45  ;;  %v3741_v49 = vpop.f32.mrb[13].mxu0  ;;  %v1789_v43 = vld [vmem:[#allocation2 + $0x4c0] sm:$0xff]  ;;  %v1790_v45 = vld [vmem:[#allocation2 + $0x4c8] sm:$0xff] }
 0xa9f   : > { %v4653_v49 = vpack.c.bf16 %v1790_v45, %v1789_v43  ;;  %v1976_v43 = vld [vmem:[#allocation2 + $0x598] sm:$0xff] }
 0xaa0   : > { %4963 = vtanh.f32 %v5630_v46  ;;  %v1617_v24 = vsel %vm266_vm1, %v5630_v46, 0.0  ;;  %v1877_v46 = vld [vmem:[#allocation2 + $0x500] sm:$0xff]  ;;  %v4692_v45 = vpack.c.bf16 %v1976_v43, %v1975_v40  ;;  %v2226_v40 = vld [vmem:[#allocation2 + $0x610] sm:$0xff] }
 0xaaa   : > { %v4964_v50 = vpop.eup %4963 }
 0xaab   : > { %v1465_v52 = vmul.f32 0.1, %v4964_v50  ;;  %v1791_v50 = vld [vmem:[#allocation2 + $0x4d0] sm:$0xff] }
 0xaad   : > { %v1466_v53 = vsel %vm5507_vm4, %v1465_v52, 0.0  ;;  %v1792_v52 = vld [vmem:[#allocation2 + $0x4d8] sm:$0xff] }
 0xaae   : > { %1467 = vadd.xlane.f32.xlu0 %v1466_v53 }
 0xb3b   : > { %v1468_v54 = vpop.xlane.xlu0 %1467 }
 0xb3c   : > { %v1469_v55 = vsub.f32 0.0, %v1468_v54  ;;  %v1793_v54 = vld [vmem:[#allocation2 + $0x4e0] sm:$0xff] }
 0xb3e   : > { %v1470_v56 = vsel %vm270_vm5, %v1469_v55, %v1466_v53  ;;  %v4656_v53 = vpack.c.bf16 %v1792_v52, %v1791_v50  ;;  %v1794_v55 = vld [vmem:[#allocation2 + $0x4e8] sm:$0xff] }
 0xb3f   : > { %v1471_v57 = vmul.f32 1.442695, %v1470_v56  ;;  %v4659_v56 = vpack.c.bf16 %v1794_v55, %v1793_v54  ;;  %v1978_v50 = vld [vmem:[#allocation2 + $0x5a8] sm:$0xff]  ;;  %v1980_v54 = vld [vmem:[#allocation2 + $0x5b8] sm:$0xff] }
 0xb41   : > { %4965 = vpow2.f32 %v1471_v57  ;;  %v1795_v57 = vld [vmem:[#allocation2 + $0x4f0] sm:$0xff] }
 0xb4b   : > { %v4966_v58 = vpop.eup %4965 }
 0xb4c   : > { %v1473_v59 = vmul.f32 %v4966_v58, %v5569_v61  ;;  %v1624_v61 = vld [vmem:[#allocation5 + $0xa0] sm:$0xff]  ;;  %v1796_v58 = vld [vmem:[#allocation2 + $0x4f8] sm:$0xff] }
 0xb4d   : > { %v5649_v7 = vpack.c.bf16 %v1625_v6, %v1624_v61 }
 0xb4e   : > { %v1474_v60 = vpack.c.bf16 %v1473_v59, %v1473_v59 }
 0xb50   : > { %v1475_v2 = vunpack.c.l.bf16 %v1474_v60 }
 0xb52   : > { %3810 = vmatmul.mubr.f32.vlgmr.msra.gmra.mrb[14].mxu0 %v1475_v2  ;;  %v1476_v4 = vsub.f32 %v1473_v59, %v1475_v2  ;;  %v4662_v59 = vpack.c.bf16 %v1796_v58, %v1795_v57  ;;  %v1982_v57 = vld [vmem:[#allocation2 + $0x5c8] sm:$0xff] }
 0xb53   : > { %3914 = vmatprep.mubr.msk.f32.mxu0 %vm5141_vm0, %v5142_v1  ;;  %4642 = vmatpush3.bf16.msra.mxu0 %v4641_v31  ;;  %v1890_v31 = vld [vmem:[#allocation2 + $0x568] sm:$0xff] }
 0xb54   : > { %3775 = vmatmul.mubr.f32.vlgmr.msra.gmra.mrb[10].mxu1 %v1476_v4  ;;  %4643 = vmatprep.subr.bf16.mxu0 %v5140_v0  ;;  %v4683_v32 = vpack.c.bf16 %v1890_v31, %v1889_v29 }
 0xb55   : > { %4594 = vmatpush3.bf16.msra.mxu1 %v5638_v3  ;;  %3844 = vmatprep.mubr.msk.f32.mxu1 %vm5141_vm0, %v5142_v1 }
 0xb56   : > { %4595 = vmatprep.subr.bf16.mxu1 %v5140_v0 }
 0xb57   : > { %4645 = vmatpush3.bf16.msra.mxu0 %v4644_v34  ;;  %v1891_v34 = vld [vmem:[#allocation2 + $0x570] sm:$0xff] }
 0xb58   : > { %4646 = vmatprep.subr.bf16.mxu0 %v5140_v0  ;;  %v4686_v36 = vpack.c.bf16 %v1892_v35, %v1891_v34  ;;  %v2224_v34 = vld [vmem:[#allocation2 + $0x600] sm:$0xff]  ;;  %v2225_v35 = vld [vmem:[#allocation2 + $0x608] sm:$0xff] }
 0xb59   : > { %4597 = vmatpush3.bf16.msra.mxu1 %v5643_v30 }
 0xb5a   : > { %4598 = vmatprep.subr.bf16.mxu1 %v5140_v0 }
 0xb5b   : > { %4648 = vmatpush3.bf16.msra.mxu0 %v4647_v37  ;;  %v1973_v37 = vld [vmem:[#allocation2 + $0x580] sm:$0xff] }
 0xb5c   : > { %4649 = vmatprep.subr.bf16.mxu0 %v5140_v0 }
 0xb5d   : > { %4600 = vmatpush3.bf16.msra.mxu1 %v5649_v7 }
 0xb5e   : > { %4601 = vmatprep.subr.bf16.mxu1 %v5140_v0 }
 0xb5f   : > { %4651 = vmatpush3.bf16.msra.mxu0 %v4650_v42  ;;  %v4689_v42 = vpack.c.bf16 %v1974_v39, %v1973_v37  ;;  %v4761_v37 = vpack.c.bf16 %v2225_v35, %v2224_v34 }
 0xb60   : > { %4652 = vmatprep.subr.bf16.mxu0 %v5140_v0 }
 0xb61   : > { %4603 = vmatpush3.bf16.msra.mxu1 %v5653_v10 }
 0xb62   : > { %4604 = vmatprep.subr.bf16.mxu1 %v5140_v0 }
 0xb63   : > { %4654 = vmatpush3.bf16.msra.mxu0 %v4653_v49  ;;  %v1977_v49 = vld [vmem:[#allocation2 + $0x5a0] sm:$0xff] }
 0xb64   : > { %4655 = vmatprep.subr.bf16.mxu0 %v5140_v0  ;;  %v4695_v52 = vpack.c.bf16 %v1978_v50, %v1977_v49  ;;  %v2230_v50 = vld [vmem:[#allocation2 + $0x630] sm:$0xff] }
 0xb65   : > { %4606 = vmatpush3.bf16.msra.mxu1 %v5657_v13 }
 0xb66   : > { %4607 = vmatprep.subr.bf16.mxu1 %v5140_v0 }
 0xb67   : > { %4657 = vmatpush3.bf16.msra.mxu0 %v4656_v53  ;;  %v1979_v53 = vld [vmem:[#allocation2 + $0x5b0] sm:$0xff] }
 0xb68   : > { %4658 = vmatprep.subr.bf16.mxu0 %v5140_v0  ;;  %v4698_v55 = vpack.c.bf16 %v1980_v54, %v1979_v53  ;;  %v2232_v54 = vld [vmem:[#allocation2 + $0x640] sm:$0xff] }
 0xb69   : > { %4609 = vmatpush3.bf16.msra.mxu1 %v5662_v16 }
 0xb6a   : > { %4610 = vmatprep.subr.bf16.mxu1 %v5140_v0 }
 0xb6b   : > { %4660 = vmatpush3.bf16.msra.mxu0 %v4659_v56  ;;  %v1981_v56 = vld [vmem:[#allocation2 + $0x5c0] sm:$0xff] }
 0xb6c   : > { %4661 = vmatprep.subr.bf16.mxu0 %v5140_v0  ;;  %v4701_v58 = vpack.c.bf16 %v1982_v57, %v1981_v56  ;;  %v2234_v57 = vld [vmem:[#allocation2 + $0x650] sm:$0xff] }
 0xb6d   : > { %4612 = vmatpush3.bf16.msra.mxu1 %v5666_v19 }
 0xb6e   : > { %4613 = vmatprep.subr.bf16.mxu1 %v5140_v0 }
 0xb6f   : > { %4663 = vmatpush3.bf16.msra.mxu0 %v4662_v59  ;;  %v1983_v59 = vld [vmem:[#allocation2 + $0x5d0] sm:$0xff] }
 0xb70   : > { %4664 = vmatprep.subr.bf16.mxu0 %v5140_v0 }
 0xb71   : > { %4615 = vmatpush3.bf16.msra.mxu1 %v5670_v25 }
 0xb72   : > { %4616 = vmatprep.subr.bf16.mxu1 %v5140_v0 }
 0xc25   : > { %v1613_v60 = vpop.f32.mrb[14].mxu0 }
 0xc26   : > { %v3811_v62 = vpop.f32.mrb[15].mxu0 }
 0xc27   : > { %v1543_v63 = vpop.f32.mrb[10].mxu1 }
 0xc28   : > { %v1614_v2 = vadd.f32 %v1613_v60, %v1543_v63  ;;  %v3776_v4 = vpop.f32.mrb[11].mxu1  ;;  %v1984_v60 = vld [vmem:[#allocation2 + $0x5d8] sm:$0xff]  ;;  %v1985_v63 = vld [vmem:[#allocation2 + $0x5e0] sm:$0xff] }
 0xc29   : > { %v4704_v62 = vpack.c.bf16 %v1984_v60, %v1983_v59  ;;  %v2236_v60 = vld [vmem:[#allocation2 + $0x660] sm:$0xff] }
 0xc2a   : > { %v1618_v5 = vadd.f32 %v1617_v24, %v1614_v2  ;;  %v1986_v2 = vld [vmem:[#allocation2 + $0x5e8] sm:$0xff] }
 0xc2b   : > { %v4707_v4 = vpack.c.bf16 %v1986_v2, %v1985_v63  ;;  %v2811_v24 = vld [vmem:[%s5918_s2 + $0x9] ss:$0 sm:$0xff]  ;;  %v2238_v2 = vld [vmem:[#allocation2 + $0x670] sm:$0xff] }
 0xc2c   : > { %v1636_v61 = vpack.c.bf16 %v1618_v5, %v1618_v5 }
 0xc2e   : > { %v1637_v6 = vunpack.c.l.bf16 %v1636_v61 }
 0xc30   : > { %v1638_v8 = vsub.f32 %v1618_v5, %v1637_v6 }
 0xc32   : > { %3845 = vmatmul.mubr.f32.vlgmr.msra.gmra.mrb[12].mxu1 %v1638_v8 }
 0xc33   : > { %4618 = vmatpush3.bf16.msra.mxu1 %v5638_v3  ;;  %3879 = vmatprep.mubr.msk.f32.mxu1 %vm5141_vm0, %v5142_v1  ;;  %v1878_v3 = vld [vmem:[#allocation2 + $0x508] sm:$0xff] }
 0xc34   : > { %4619 = vmatprep.subr.bf16.mxu1 %v5140_v0 }
 0xc37   : > { %4621 = vmatpush3.bf16.msra.mxu1 %v5643_v30  ;;  %v4665_v30 = vpack.c.bf16 %v1878_v3, %v1877_v46  ;;  %v1987_v46 = vld [vmem:[#allocation2 + $0x5f0] sm:$0xff]  ;;  %v1988_v3 = vld [vmem:[#allocation2 + $0x5f8] sm:$0xff] }
 0xc38   : > { %4622 = vmatprep.subr.bf16.mxu1 %v5140_v0 }
 0xc3b   : > { %4624 = vmatpush3.bf16.msra.mxu1 %v5649_v7  ;;  %v1879_v7 = vld [vmem:[#allocation2 + $0x510] sm:$0xff] }
 0xc3c   : > { %4625 = vmatprep.subr.bf16.mxu1 %v5140_v0  ;;  %v4668_v12 = vpack.c.bf16 %v1880_v9, %v1879_v7  ;;  %v2814_v7 = vld [vmem:[%s5918_s2 + $0xa] ss:$0 sm:$0xff] }
 0xc3f   : > { %4627 = vmatpush3.bf16.msra.mxu1 %v5653_v10 }
 0xc40   : > { %4628 = vmatprep.subr.bf16.mxu1 %v5140_v0 }
 0xc43   : > { %4630 = vmatpush3.bf16.msra.mxu1 %v5657_v13  ;;  %v1881_v13 = vld [vmem:[#allocation2 + $0x520] sm:$0xff] }
 0xc44   : > { %4631 = vmatprep.subr.bf16.mxu1 %v5140_v0  ;;  %v4671_v15 = vpack.c.bf16 %v1882_v14, %v1881_v13  ;;  %v2816_v14 = vld [vmem:[%s5918_s2 + $0xb] ss:$0 sm:$0xff] }
 0xc47   : > { %4633 = vmatpush3.bf16.msra.mxu1 %v5662_v16  ;;  %v1883_v16 = vld [vmem:[#allocation2 + $0x530] sm:$0xff] }
 0xc48   : > { %4634 = vmatprep.subr.bf16.mxu1 %v5140_v0  ;;  %v4674_v47 = vpack.c.bf16 %v1884_v17, %v1883_v16 }
 0xc4b   : > { %4636 = vmatpush3.bf16.msra.mxu1 %v5666_v19  ;;  %v1885_v19 = vld [vmem:[#allocation2 + $0x540] sm:$0xff] }
 0xc4c   : > { %4637 = vmatprep.subr.bf16.mxu1 %v5140_v0  ;;  %v4677_v22 = vpack.c.bf16 %v1886_v20, %v1885_v19 }
 0xc4f   : > { %4639 = vmatpush3.bf16.msra.mxu1 %v5670_v25  ;;  %v1887_v25 = vld [vmem:[#allocation2 + $0x550] sm:$0xff] }
 0xc50   : > { %4688 = vmatprep.subr.bf16.mxu1 %v5140_v0  ;;  %v4680_v28 = vpack.c.bf16 %v1888_v26, %v1887_v25 }
 0xc52   : > { %3880 = vmatmul.mubr.f32.vlgmr.msra.gmra.mrb[12].mxu1 %v1637_v6 }
 0xc53   : > { %3984 = vmatprep.mubr.msk.f32.mxu1 %vm5141_vm0, %v5142_v1  ;;  %4690 = vmatpush3.bf16.msra.mxu1 %v4689_v42  ;;  %v2227_v42 = vld [vmem:[#allocation2 + $0x618] sm:$0xff] }
 0xc54   : > { %4691 = vmatprep.subr.bf16.mxu1 %v5140_v0  ;;  %v4764_v43 = vpack.c.bf16 %v2227_v42, %v2226_v40  ;;  %v2416_v42 = vld [vmem:[#allocation2 + $0x700] sm:$0xff] }
 0xc57   : > { %4693 = vmatpush3.bf16.msra.mxu1 %v4692_v45  ;;  %v2229_v45 = vld [vmem:[#allocation2 + $0x628] sm:$0xff] }
 0xc58   : > { %4694 = vmatprep.subr.bf16.mxu1 %v5140_v0 }
 0xc5b   : > { %4696 = vmatpush3.bf16.msra.mxu1 %v4695_v52  ;;  %v2231_v52 = vld [vmem:[#allocation2 + $0x638] sm:$0xff] }
 0xc5c   : > { %4697 = vmatprep.subr.bf16.mxu1 %v5140_v0  ;;  %v4770_v53 = vpack.c.bf16 %v2231_v52, %v2230_v50  ;;  %v2420_v50 = vld [vmem:[#allocation2 + $0x720] sm:$0xff]  ;;  %v2421_v52 = vld [vmem:[#allocation2 + $0x728] sm:$0xff] }
 0xc5f   : > { %4699 = vmatpush3.bf16.msra.mxu1 %v4698_v55  ;;  %v2233_v55 = vld [vmem:[#allocation2 + $0x648] sm:$0xff] }
 0xc60   : > { %4700 = vmatprep.subr.bf16.mxu1 %v5140_v0  ;;  %v4773_v56 = vpack.c.bf16 %v2233_v55, %v2232_v54  ;;  %v2422_v54 = vld [vmem:[#allocation2 + $0x730] sm:$0xff]  ;;  %v2423_v55 = vld [vmem:[#allocation2 + $0x738] sm:$0xff] }
 0xc63   : > { %4702 = vmatpush3.bf16.msra.mxu1 %v4701_v58  ;;  %v2235_v58 = vld [vmem:[#allocation2 + $0x658] sm:$0xff] }
 0xc64   : > { %4703 = vmatprep.subr.bf16.mxu1 %v5140_v0  ;;  %v4776_v59 = vpack.c.bf16 %v2235_v58, %v2234_v57  ;;  %v2424_v57 = vld [vmem:[#allocation2 + $0x740] sm:$0xff]  ;;  %v2425_v58 = vld [vmem:[#allocation2 + $0x748] sm:$0xff] }
 0xc67   : > { %4705 = vmatpush3.bf16.msra.mxu1 %v4704_v62  ;;  %v2237_v62 = vld [vmem:[#allocation2 + $0x668] sm:$0xff] }
 0xc68   : > { %4706 = vmatprep.subr.bf16.mxu1 %v5140_v0  ;;  %v4779_v63 = vpack.c.bf16 %v2237_v62, %v2236_v60  ;;  %v2426_v60 = vld [vmem:[#allocation2 + $0x750] sm:$0xff]  ;;  %v2427_v62 = vld [vmem:[#allocation2 + $0x758] sm:$0xff] }
 0xc6b   : > { %4708 = vmatpush3.bf16.msra.mxu1 %v4707_v4  ;;  %v2239_v4 = vld [vmem:[#allocation2 + $0x678] sm:$0xff] }
 0xc6c   : > { %4709 = vmatprep.subr.bf16.mxu1 %v5140_v0 }
 0xd25   : > { %v5705_v10 = vpop.f32.mrb[12].mxu1 }
 0xd26   : > { %v3881_v11 = vpop.f32.mrb[13].mxu1  ;;  %3915 = vmatmul.mubr.msk.f32.vlgmr.msra.gmra.mrb[16].mxu0 %vm266_vm1, %v5705_v10 }
 0xd27   : > { %4666 = vmatpush3.bf16.msra.mxu0 %v4665_v30  ;;  %3949 = vmatprep.mubr.msk.f32.mxu0 %vm5141_vm0, %v5142_v1  ;;  %v4710_v30 = vpack.c.bf16 %v1988_v3, %v1987_v46  ;;  %v2323_v46 = vld [vmem:[#allocation2 + $0x698] sm:$0xff] }
 0xd28   : > { %4667 = vmatprep.subr.bf16.mxu0 %v5140_v0 }
 0xd29   : > { %4711 = vmatpush3.bf16.msra.mxu1 %v4710_v30  ;;  %v2324_v30 = vld [vmem:[#allocation2 + $0x6a0] sm:$0xff] }
 0xd2a   : > { %4736 = vmatprep.subr.bf16.mxu1 %v5140_v0 }
 0xd2b   : > { %4669 = vmatpush3.bf16.msra.mxu0 %v4668_v12 }
 0xd2c   : > { %4670 = vmatprep.subr.bf16.mxu0 %v5140_v0 }
 0xd2f   : > { %4672 = vmatpush3.bf16.msra.mxu0 %v4671_v15 }
 0xd30   : > { %4673 = vmatprep.subr.bf16.mxu0 %v5140_v0 }
 0xd33   : > { %4675 = vmatpush3.bf16.msra.mxu0 %v4674_v47 }
 0xd34   : > { %4676 = vmatprep.subr.bf16.mxu0 %v5140_v0 }
 0xd37   : > { %4678 = vmatpush3.bf16.msra.mxu0 %v4677_v22 }
 0xd38   : > { %4679 = vmatprep.subr.bf16.mxu0 %v5140_v0 }
 0xd3b   : > { %4681 = vmatpush3.bf16.msra.mxu0 %v4680_v28 }
 0xd3c   : > { %4682 = vmatprep.subr.bf16.mxu0 %v5140_v0 }
 0xd3f   : > { %4684 = vmatpush3.bf16.msra.mxu0 %v4683_v32 }
 0xd40   : > { %4685 = vmatprep.subr.bf16.mxu0 %v5140_v0 }
 0xd43   : > { %4687 = vmatpush3.bf16.msra.mxu0 %v4686_v36 }
 0xd44   : > { %4712 = vmatprep.subr.bf16.mxu0 %v5140_v0 }
 0xdf9   : > { %v1871_v5 = vpop.f32.mrb[16].mxu0 }
 0xdfa   : > { %v1872_v61 = vadd.f32 %v2811_v24, %v1871_v5  ;;  %v3916_v6 = vpop.f32.mrb[17].mxu0  ;;  %v4782_v24 = vpack.c.bf16 %v2239_v4, %v2238_v2  ;;  %v2320_v5 = vld [vmem:[#allocation2 + $0x680] sm:$0xff]  ;;  %v2429_v4 = vld [vmem:[#allocation2 + $0x768] sm:$0xff] }
 0xdfb   : > { %v2322_v6 = vld [vmem:[#allocation2 + $0x690] sm:$0xff]  ;;  %v2428_v2 = vld [vmem:[#allocation2 + $0x760] sm:$0xff] }
 0xdfc   : > { %v1875_v8 = vmax.f32 %v1872_v61, 0.0  ;;  %v2321_v61 = vld [vmem:[#allocation2 + $0x688] sm:$0xff]  ;;  %v4788_v3 = vpack.c.bf16 %v2323_v46, %v2322_v6 }
 0xdfe   : > { %3950 = vmatmul.mubr.f32.vlgmr.msra.gmra.mrb[18].mxu0 %v1875_v8  ;;  %v4785_v8 = vpack.c.bf16 %v2321_v61, %v2320_v5  ;;  %v2818_v5 = vld [vmem:[%s5918_s2 + $0xc] ss:$0 sm:$0xff] }
 0xdff   : > { %4714 = vmatpush3.bf16.msra.mxu0 %v5481_v21  ;;  %4019 = vmatprep.mubr.msk.f32.mxu0 %vm5141_vm0, %v5142_v1 }
 0xe00   : > { %4715 = vmatprep.subr.bf16.mxu0 %v5140_v0 }
 0xe03   : > { %4717 = vmatpush3.bf16.msra.mxu0 %v5485_v23 }
 0xe04   : > { %4718 = vmatprep.subr.bf16.mxu0 %v5140_v0 }
 0xe07   : > { %4720 = vmatpush3.bf16.msra.mxu0 %v5491_v27 }
 0xe08   : > { %4721 = vmatprep.subr.bf16.mxu0 %v5140_v0 }
 0xe0b   : > { %4723 = vmatpush3.bf16.msra.mxu0 %v5513_v38 }
 0xe0c   : > { %4724 = vmatprep.subr.bf16.mxu0 %v5140_v0 }
 0xe0f   : > { %4726 = vmatpush3.bf16.msra.mxu0 %v5519_v41 }
 0xe10   : > { %4727 = vmatprep.subr.bf16.mxu0 %v5140_v0 }
 0xe13   : > { %4729 = vmatpush3.bf16.msra.mxu0 %v5523_v44 }
 0xe14   : > { %4730 = vmatprep.subr.bf16.mxu0 %v5140_v0 }
 0xe17   : > { %4732 = vmatpush3.bf16.msra.mxu0 %v5529_v48 }
 0xe18   : > { %4733 = vmatprep.subr.bf16.mxu0 %v5140_v0 }
 0xe1b   : > { %4735 = vmatpush3.bf16.msra.mxu0 %v5535_v51 }
 0xe1c   : > { %4760 = vmatprep.subr.bf16.mxu0 %v5140_v0 }
 0xed1   : > { %v1967_v9 = vpop.f32.mrb[18].mxu0 }
 0xed2   : > { %v1968_v11 = vadd.f32 %v2814_v7, %v1967_v9  ;;  %v3951_v12 = vpop.f32.mrb[19].mxu0  ;;  %v2325_v7 = vld [vmem:[#allocation2 + $0x6a8] sm:$0xff] }
 0xed3   : > { %v4791_v9 = vpack.c.bf16 %v2325_v7, %v2324_v30  ;;  %v2327_v12 = vld [vmem:[#allocation2 + $0x6b8] sm:$0xff] }
 0xed4   : > { %v1971_v13 = vmax.f32 %v1968_v11, 0.0  ;;  %v2326_v11 = vld [vmem:[#allocation2 + $0x6b0] sm:$0xff]  ;;  %v2431_v30 = vld [vmem:[#allocation2 + $0x778] sm:$0xff] }
 0xed6   : > { %3985 = vmatmul.mubr.f32.vlgmr.msra.gmra.mrb[14].mxu1 %v1971_v13  ;;  %v4794_v13 = vpack.c.bf16 %v2327_v12, %v2326_v11 }
 0xed7   : > { %4738 = vmatpush3.bf16.msra.mxu1 %v5481_v21  ;;  %4054 = vmatprep.mubr.msk.f32.mxu1 %vm5141_vm0, %v5142_v1 }
 0xed8   : > { %4739 = vmatprep.subr.bf16.mxu1 %v5140_v0 }
 0xedb   : > { %4741 = vmatpush3.bf16.msra.mxu1 %v5485_v23 }
 0xedc   : > { %4742 = vmatprep.subr.bf16.mxu1 %v5140_v0 }
 0xedf   : > { %4744 = vmatpush3.bf16.msra.mxu1 %v5491_v27 }
 0xee0   : > { %4745 = vmatprep.subr.bf16.mxu1 %v5140_v0 }
 0xee3   : > { %4747 = vmatpush3.bf16.msra.mxu1 %v5513_v38 }
 0xee4   : > { %4748 = vmatprep.subr.bf16.mxu1 %v5140_v0 }
 0xee7   : > { %4750 = vmatpush3.bf16.msra.mxu1 %v5519_v41 }
 0xee8   : > { %4751 = vmatprep.subr.bf16.mxu1 %v5140_v0 }
 0xeeb   : > { %4753 = vmatpush3.bf16.msra.mxu1 %v5523_v44 }
 0xeec   : > { %4754 = vmatprep.subr.bf16.mxu1 %v5140_v0 }
 0xeef   : > { %4756 = vmatpush3.bf16.msra.mxu1 %v5529_v48 }
 0xef0   : > { %4757 = vmatprep.subr.bf16.mxu1 %v5140_v0 }
 0xef3   : > { %4759 = vmatpush3.bf16.msra.mxu1 %v5535_v51 }
 0xef4   : > { %4784 = vmatprep.subr.bf16.mxu1 %v5140_v0 }
 0xfa9   : > { %v2063_v15 = vpop.f32.mrb[14].mxu1 }
 0xfaa   : > { %v5773_v16 = vadd.f32 %v2816_v14, %v2063_v15  ;;  %v3986_v17 = vpop.f32.mrb[15].mxu1  ;;  %v2328_v14 = vld [vmem:[#allocation2 + $0x6c0] sm:$0xff]  ;;  %v2329_v15 = vld [vmem:[#allocation2 + $0x6c8] sm:$0xff] }
 0xfab   : > { %v4797_v17 = vpack.c.bf16 %v2329_v15, %v2328_v14 }
 0xfac   : > { %4967 = vtanh.f32 %v5773_v16  ;;  %v2220_v35 = vsel %vm266_vm1, %v5773_v16, 0.0  ;;  %v2419_v16 = vld [vmem:[#allocation2 + $0x718] sm:$0xff] }
 0xfb6   : > { %v4968_v47 = vpop.eup %4967 }
 0xfb7   : > { %v2068_v19 = vmul.f32 0.1, %v4968_v47  ;;  %v2330_v47 = vld [vmem:[#allocation2 + $0x6d0] sm:$0xff] }
 0xfb9   : > { %v2069_v20 = vsel %vm5507_vm4, %v2068_v19, 0.0  ;;  %v2331_v19 = vld [vmem:[#allocation2 + $0x6d8] sm:$0xff] }
 0xfba   : > { %2070 = vadd.xlane.f32.xlu1 %v2069_v20 }
0x1047   : > { %v2071_v22 = vpop.xlane.xlu1 %2070 }
0x1048   : > { %v2072_v25 = vsub.f32 0.0, %v2071_v22  ;;  %v2332_v22 = vld [vmem:[#allocation2 + $0x6e0] sm:$0xff] }
0x104a   : > { %v2073_v26 = vsel %vm270_vm5, %v2072_v25, %v2069_v20  ;;  %v4800_v20 = vpack.c.bf16 %v2331_v19, %v2330_v47  ;;  %v2333_v25 = vld [vmem:[#allocation2 + $0x6e8] sm:$0xff] }
0x104b   : > { %v2074_v28 = vmul.f32 1.442695, %v2073_v26  ;;  %v4803_v26 = vpack.c.bf16 %v2333_v25, %v2332_v22 }
0x104d   : > { %4969 = vpow2.f32 %v2074_v28 }
0x1057   : > { %v4970_v29 = vpop.eup %4969 }
0x1058   : > { %v2076_v31 = vmul.f32 %v4970_v29, %v5705_v10  ;;  %v2228_v10 = vld [vmem:[#allocation2 + $0x620] sm:$0xff] }
0x1059   : > { %v4767_v49 = vpack.c.bf16 %v2229_v45, %v2228_v10  ;;  %v2418_v10 = vld [vmem:[#allocation2 + $0x710] sm:$0xff] }
0x105a   : > { %v2077_v32 = vpack.c.bf16 %v2076_v31, %v2076_v31 }
0x105c   : > { %v2078_v36 = vunpack.c.l.bf16 %v2077_v32 }
0x105e   : > { %4055 = vmatmul.mubr.f32.vlgmr.msra.gmra.mrb[16].mxu1 %v2078_v36  ;;  %v2079_v39 = vsub.f32 %v2076_v31, %v2078_v36 }
0x105f   : > { %4124 = vmatprep.mubr.msk.f32.mxu1 %vm5141_vm0, %v5142_v1  ;;  %4786 = vmatpush3.bf16.msra.mxu1 %v4785_v8 }
0x1060   : > { %4020 = vmatmul.mubr.f32.vlgmr.msra.gmra.mrb[20].mxu0 %v2079_v39  ;;  %4787 = vmatprep.subr.bf16.mxu1 %v5140_v0  ;;  %v2335_v39 = vld [vmem:[#allocation2 + $0x6f8] sm:$0xff] }
0x1061   : > { %4762 = vmatpush3.bf16.msra.mxu0 %v4761_v37  ;;  %4089 = vmatprep.mubr.msk.f32.mxu0 %vm5141_vm0, %v5142_v1  ;;  %v2334_v37 = vld [vmem:[#allocation2 + $0x6f0] sm:$0xff] }
0x1062   : > { %4763 = vmatprep.subr.bf16.mxu0 %v5140_v0  ;;  %v4806_v40 = vpack.c.bf16 %v2335_v39, %v2334_v37 }
0x1063   : > { %4789 = vmatpush3.bf16.msra.mxu1 %v4788_v3  ;;  %v2430_v3 = vld [vmem:[#allocation2 + $0x770] sm:$0xff] }
0x1064   : > { %4790 = vmatprep.subr.bf16.mxu1 %v5140_v0  ;;  %v4830_v7 = vpack.c.bf16 %v2431_v30, %v2430_v3 }
0x1065   : > { %4765 = vmatpush3.bf16.msra.mxu0 %v4764_v43  ;;  %v2417_v43 = vld [vmem:[#allocation2 + $0x708] sm:$0xff] }
0x1066   : > { %4766 = vmatprep.subr.bf16.mxu0 %v5140_v0  ;;  %v4809_v45 = vpack.c.bf16 %v2417_v43, %v2416_v42 }
0x1067   : > { %4792 = vmatpush3.bf16.msra.mxu1 %v4791_v9  ;;  %v2821_v9 = vld [vmem:[%s5918_s2 + $0xd] ss:$0 sm:$0xff] }
0x1068   : > { %4793 = vmatprep.subr.bf16.mxu1 %v5140_v0 }
0x1069   : > { %4768 = vmatpush3.bf16.msra.mxu0 %v4767_v49  ;;  %v4812_v49 = vpack.c.bf16 %v2419_v16, %v2418_v10 }
0x106a   : > { %4769 = vmatprep.subr.bf16.mxu0 %v5140_v0 }
0x106b   : > { %4795 = vmatpush3.bf16.msra.mxu1 %v4794_v13 }
0x106c   : > { %4796 = vmatprep.subr.bf16.mxu1 %v5140_v0 }
0x106d   : > { %4771 = vmatpush3.bf16.msra.mxu0 %v4770_v53  ;;  %v4815_v53 = vpack.c.bf16 %v2421_v52, %v2420_v50 }
0x106e   : > { %4772 = vmatprep.subr.bf16.mxu0 %v5140_v0 }
0x106f   : > { %4798 = vmatpush3.bf16.msra.mxu1 %v4797_v17 }
0x1070   : > { %4799 = vmatprep.subr.bf16.mxu1 %v5140_v0 }
0x1071   : > { %4774 = vmatpush3.bf16.msra.mxu0 %v4773_v56  ;;  %v4818_v56 = vpack.c.bf16 %v2423_v55, %v2422_v54 }
0x1072   : > { %4775 = vmatprep.subr.bf16.mxu0 %v5140_v0 }
0x1073   : > { %4801 = vmatpush3.bf16.msra.mxu1 %v4800_v20 }
0x1074   : > { %4802 = vmatprep.subr.bf16.mxu1 %v5140_v0 }
0x1075   : > { %4777 = vmatpush3.bf16.msra.mxu0 %v4776_v59  ;;  %v4821_v59 = vpack.c.bf16 %v2425_v58, %v2424_v57 }
0x1076   : > { %4778 = vmatprep.subr.bf16.mxu0 %v5140_v0 }
0x1077   : > { %4804 = vmatpush3.bf16.msra.mxu1 %v4803_v26 }
0x1078   : > { %4805 = vmatprep.subr.bf16.mxu1 %v5140_v0 }
0x1079   : > { %4780 = vmatpush3.bf16.msra.mxu0 %v4779_v63  ;;  %v4824_v63 = vpack.c.bf16 %v2427_v62, %v2426_v60 }
0x107a   : > { %4781 = vmatprep.subr.bf16.mxu0 %v5140_v0 }
0x107b   : > { %4807 = vmatpush3.bf16.msra.mxu1 %v4806_v40 }
0x107c   : > { %4832 = vmatprep.subr.bf16.mxu1 %v5140_v0 }
0x107d   : > { %4783 = vmatpush3.bf16.msra.mxu0 %v4782_v24  ;;  %v4827_v24 = vpack.c.bf16 %v2429_v4, %v2428_v2 }
0x107e   : > { %4808 = vmatprep.subr.bf16.mxu0 %v5140_v0 }
0x1131   : > { %v2216_v28 = vpop.f32.mrb[16].mxu1 }
0x1132   : > { %v4056_v29 = vpop.f32.mrb[17].mxu1 }
0x1133   : > { %v2146_v31 = vpop.f32.mrb[20].mxu0 }
0x1134   : > { %v2217_v32 = vadd.f32 %v2216_v28, %v2146_v31  ;;  %v4021_v34 = vpop.f32.mrb[21].mxu0 }
0x1136   : > { %v5803_v36 = vadd.f32 %v2220_v35, %v2217_v32 }
0x1138   : > { %4090 = vmatmul.mubr.msk.f32.vlgmr.msra.gmra.mrb[22].mxu0 %vm266_vm1, %v5803_v36 }
0x1139   : > { %4159 = vmatprep.mubr.msk.f32.mxu0 %vm5141_vm0, %v5142_v1  ;;  %4810 = vmatpush3.bf16.msra.mxu0 %v4809_v45 }
0x113a   : > { %4811 = vmatprep.subr.bf16.mxu0 %v5140_v0 }
0x113d   : > { %4813 = vmatpush3.bf16.msra.mxu0 %v4812_v49 }
0x113e   : > { %4814 = vmatprep.subr.bf16.mxu0 %v5140_v0 }
0x1141   : > { %4816 = vmatpush3.bf16.msra.mxu0 %v4815_v53 }
0x1142   : > { %4817 = vmatprep.subr.bf16.mxu0 %v5140_v0 }
0x1145   : > { %4819 = vmatpush3.bf16.msra.mxu0 %v4818_v56 }
0x1146   : > { %4820 = vmatprep.subr.bf16.mxu0 %v5140_v0 }
0x1149   : > { %4822 = vmatpush3.bf16.msra.mxu0 %v4821_v59 }
0x114a   : > { %4823 = vmatprep.subr.bf16.mxu0 %v5140_v0 }
0x114d   : > { %4825 = vmatpush3.bf16.msra.mxu0 %v4824_v63 }
0x114e   : > { %4826 = vmatprep.subr.bf16.mxu0 %v5140_v0 }
0x1151   : > { %4828 = vmatpush3.bf16.msra.mxu0 %v4827_v24 }
0x1152   : > { %4829 = vmatprep.subr.bf16.mxu0 %v5140_v0 }
0x1155   : > { %4831 = vmatpush3.bf16.msra.mxu0 %v4830_v7 }
0x1156   : > { %4856 = vmatprep.subr.bf16.mxu0 %v5140_v0 }
0x120b   : > { %v2314_v61 = vpop.f32.mrb[22].mxu0 }
0x120c   : > { %v2315_v6 = vadd.f32 %v2818_v5, %v2314_v61  ;;  %v4091_v8 = vpop.f32.mrb[23].mxu0 }
0x120e   : > { %v2318_v46 = vmax.f32 %v2315_v6, 0.0 }
0x1210   : > { %4125 = vmatmul.mubr.f32.vlgmr.msra.gmra.mrb[18].mxu1 %v2318_v46 }
0x1211   : > { %4834 = vmatpush3.bf16.msra.mxu1 %v5481_v21  ;;  %4194 = vmatprep.mubr.msk.f32.mxu1 %vm5141_vm0, %v5142_v1 }
0x1212   : > { %4835 = vmatprep.subr.bf16.mxu1 %v5140_v0 }
0x1215   : > { %4837 = vmatpush3.bf16.msra.mxu1 %v5485_v23 }
0x1216   : > { %4838 = vmatprep.subr.bf16.mxu1 %v5140_v0 }
0x1219   : > { %4840 = vmatpush3.bf16.msra.mxu1 %v5491_v27 }
0x121a   : > { %4841 = vmatprep.subr.bf16.mxu1 %v5140_v0 }
0x121d   : > { %4843 = vmatpush3.bf16.msra.mxu1 %v5513_v38 }
0x121e   : > { %4844 = vmatprep.subr.bf16.mxu1 %v5140_v0 }
0x1221   : > { %4846 = vmatpush3.bf16.msra.mxu1 %v5519_v41 }
0x1222   : > { %4847 = vmatprep.subr.bf16.mxu1 %v5140_v0 }
0x1225   : > { %4849 = vmatpush3.bf16.msra.mxu1 %v5523_v44 }
0x1226   : > { %4850 = vmatprep.subr.bf16.mxu1 %v5140_v0 }
0x1229   : > { %4852 = vmatpush3.bf16.msra.mxu1 %v5529_v48 }
0x122a   : > { %4853 = vmatprep.subr.bf16.mxu1 %v5140_v0 }
0x122d   : > { %4855 = vmatpush3.bf16.msra.mxu1 %v5535_v51 }
0x12e3   : > { %v2410_v11 = vpop.f32.mrb[18].mxu1 }
0x12e4   : > { %v2411_v12 = vadd.f32 %v2821_v9, %v2410_v11  ;;  %v4126_v13 = vpop.f32.mrb[19].mxu1 }
0x12e6   : > { %v2414_v14 = vmax.f32 %v2411_v12, 0.0 }
0x12e8   : > { %4160 = vmatmul.mubr.f32.vlgmr.msra.gmra.mrb[24].mxu0 %v2414_v14 }
0x12e9   : > { %4858 = vmatpush3.bf16.msra.mxu0 %v5481_v21  ;;  %4229 = vmatprep.mubr.msk.f32.mxu0 %vm5141_vm0, %v5142_v1  ;;  %v2823_v1 = vld [vmem:[%s5918_s2 + $0xe] ss:$0 sm:$0xff] }
0x12ea   : > { %4859 = vmatprep.subr.bf16.mxu0 %v5140_v0 }
0x12ed   : > { %4861 = vmatpush3.bf16.msra.mxu0 %v5485_v23 }
0x12ee   : > { %4862 = vmatprep.subr.bf16.mxu0 %v5140_v0 }
0x12f1   : > { %4864 = vmatpush3.bf16.msra.mxu0 %v5491_v27 }
0x12f2   : > { %4865 = vmatprep.subr.bf16.mxu0 %v5140_v0 }
0x12f5   : > { %4867 = vmatpush3.bf16.msra.mxu0 %v5513_v38 }
0x12f6   : > { %4868 = vmatprep.subr.bf16.mxu0 %v5140_v0 }
0x12f9   : > { %4870 = vmatpush3.bf16.msra.mxu0 %v5519_v41 }
0x12fa   : > { %4871 = vmatprep.subr.bf16.mxu0 %v5140_v0 }
0x12fd   : > { %4873 = vmatpush3.bf16.msra.mxu0 %v5523_v44 }
0x12fe   : > { %4874 = vmatprep.subr.bf16.mxu0 %v5140_v0 }
0x1301   : > { %4876 = vmatpush3.bf16.msra.mxu0 %v5529_v48 }
0x1302   : > { %4877 = vmatprep.subr.bf16.mxu0 %v5140_v0 }
0x1305   : > { %4879 = vmatpush3.bf16.msra.mxu0 %v5535_v51 }
0x13bb   : > { %v2506_v21 = vpop.f32.mrb[24].mxu0 }
0x13bc   : > { %v2507_v23 = vadd.f32 %v2823_v1, %v2506_v21  ;;  %v4161_v27 = vpop.f32.mrb[25].mxu0 }
0x13be   : > { %4971 = vtanh.f32 %v2507_v23  ;;  %v2663_v31 = vsel %vm266_vm1, %v2507_v23, 0.0 }
0x13c8   : > { %v4972_v38 = vpop.eup %4971 }
0x13c9   : > { %v2511_v41 = vmul.f32 0.1, %v4972_v38 }
0x13cb   : > { %v2512_v44 = vsel %vm5507_vm4, %v2511_v41, 0.0 }
0x13cc   : > { %2513 = vadd.xlane.f32.xlu1 %v2512_v44 }
0x1459   : > { %v2514_v15 = vpop.xlane.xlu1 %2513 }
0x145a   : > { %v2515_v48 = vsub.f32 0.0, %v2514_v15 }
0x145c   : > { %v2516_v0 = vsel %vm270_vm5, %v2515_v48, %v2512_v44 }
0x145d   : > { %v2517_v51 = vmul.f32 1.442695, %v2516_v0 }
0x145f   : > { %4973 = vpow2.f32 %v2517_v51 }
0x1469   : > { %v4974_v17 = vpop.eup %4973 }
0x146a   : > { %v2519_v47 = vmul.f32 %v4974_v17, %v5803_v36 }
0x146c   : > { %v2520_v19 = vpack.c.bf16 %v2519_v47, %v2519_v47 }
0x146e   : > { %v2521_v20 = vunpack.c.l.bf16 %v2520_v19 }
0x1470   : > { %4230 = vmatmul.mubr.f32.vlgmr.msra.gmra.mrb[26].mxu0 %v2521_v20  ;;  %v2522_v22 = vsub.f32 %v2519_v47, %v2521_v20 }
0x1472   : > { %4195 = vmatmul.mubr.f32.vlgmr.msra.gmra.mrb[20].mxu1 %v2522_v22 }
0x1543   : > { %v2659_v25 = vpop.f32.mrb[26].mxu0 }
0x1544   : > { %v4231_v33 = vpop.f32.mrb[27].mxu0 }
0x1545   : > { %v2589_v26 = vpop.f32.mrb[20].mxu1 }
0x1546   : > { %v2660_v28 = vadd.f32 %v2659_v25, %v2589_v26  ;;  %v4196_v29 = vpop.f32.mrb[21].mxu1 }
0x1548   : > { %v2664_v32 = vadd.f32 %v2663_v31, %v2660_v28 }
0x154a   : > { %v2666_v34 = vand.u32 2147483647, %v2664_v32  ;;  %v2665_v42 = vmax.f32 %v2664_v32, 0.0 }
0x154c   : > { %v2667_v35 = vsub.f32 0.0, %v2666_v34 }
0x154e   : > { %v2668_v37 = vmul.f32 1.442695, %v2667_v35 }
0x1550   : > { %4975 = vpow2.f32 %v2668_v37 }
0x155a   : > { %v4976_v36 = vpop.eup %4975 }
0x155b   : > { %v2670_v39 = vadd.f32 1.0, %v4976_v36 }
0x155d   : > { %4977 = vlog2.f32 %v2670_v39 }
0x1567   : > { %v4978_v40 = vpop.eup %4977 }
0x1568   : > { %v2672_v43 = vmul.f32 0.6931472, %v4978_v40 }
0x156a   : > { %v2673_v10 = vadd.f32 %v2672_v43, %v2665_v42 }
0x156c   : > { %2674 = vst [vmem:[%s259_s9] sm:$0xff] %v2673_v10 }
0x156d   : > { %5076 = shalt.err (!%p5073_p9)
}
0x156e   : > { %s5077_s6 = scalar_lea.hbm %s5874_s15, 128  ;;  %s5081_s27 = scalar_lea.hbm %s5921_s5, 256 }
0x156f   : > { %p5078_p2 = scmp.ne.s32.totalorder %s5874_s15, %s5077_s6  ;;  %p5082_p5 = scmp.lt.u32.totalorder %s5874_s15, %s5921_s5 }
0x1570   : > { %p5083_p10 = scmp.lt.u32.totalorder %s5081_s27, %s5077_s6  ;;  %p5085_p4 = scmp.lt.u32.totalorder %s5077_s6, %s5874_s15 }
0x1571   : > { %p5079_p0 = pnand %p5078_p2, %p5938_p7 }
0x1572   : > { %p5084_p12 = por %p5083_p10, %p5082_p5 }
0x1573   : > { %p5080_p3 = pneg %p5079_p0 }
0x1574   : > { %p5086_p8 = por %p5085_p4, %p5084_p12 }
0x1576   : > { %p5087_p11 = pnand %p5086_p8, %p5080_p3 }
0x1578   : > { %5090 = shalt.err (!%p5087_p11)
}
0x1579   : > { %4896 = dma.vmem_to_hbm [thread:$0]  (%p5938_p7), %s5876_s11, 128, %s5874_s15, %s2676_s16  }
0x157a PF: > { %p4918_p13 = scmp.ge.s32.totalorder %s5133_s21, 2  ;;  %s2701_s12 = sand.u32 1, %s5121_s18  }
0x157b   : > { %p5939_p1 = scmp.ne.s32.totalorder %s5927_s29, 0  ;;  %s2702_s23 = scalar_lea.sflag [#allocation4], %s2701_s12 }
0x157d   : > { %p4909_p6 = pnand %p4918_p13, %p5939_p1 }
0x157f   : > { %5116 = dma.done.wait (!%p4909_p6), %s2702_s23, 128  }
0x1580   : > { %5118 = vsyncadd (!%p4909_p6), %s2702_s23, 4294967168  ;;  %s5940_s9 = sld [smem:[#allocation12_spill]]  ;;  %p17_p9 = scmp.ge.s32.totalorder %s5199_s24, 4  }
0x1581   : > { %s5941_s18 = smov %s5125_s19  ;;  %s5942_s19 = smov %s5129_s20 }
0x1582   : > { %s5944_s21 = smov %s5199_s24  ;;  %19 = sbr.rel (!%p17_p9) target bundleno = 5 (0x5), region = 117 }
0x1586   : > { %s5943_s20 = smov %s5940_s9 }
0x1589   :  { %2707 = vsyncpa [#allocation3], 1 }
0x158a   :  { %2709 = vsyncpa [#allocation3 + $0x1], 1 }
0x158b   :  { %2710 = vsyncpa [#allocation6], 1 }
0x158c   :  { %2711 = vsyncpa [#allocation4], 1 }
0x158d   :  { %2713 = vsyncpa [#allocation4 + $0x1], 1 }

</bundles_post_ra>
